<compile_context>
chip_gen: v7x
topology: tpu7x:2x2x1
jax: 0.10.0
libtpu: 0.0.40
codegen_flags: <defaults>
</compile_context>

<pallas_src>
import functools

import jax
import jax.numpy as jnp
from jax.experimental import pallas as pl
from jax.experimental.pallas import tpu as pltpu

LANES = 128
ACC_ROWS = 64                 # resident accumulator block (64,128) f32 = 8 vregs
FAST_PATH_ELEMS = 64 * 1024   # below this, a fused XLA reduce beats launch cost


def _round_up(x, m):
    return ((x + m - 1) // m) * m


def _device_info():
    """Return (max_tile_rows, num_tensorcores) with conservative fallbacks."""
    max_tile_rows, cores = 8192, 1          # 4 MiB f32 tiles, single TC
    try:
        dev = jax.devices()[0]
        kind = str(getattr(dev, "device_kind", "")).lower()
        if ("v6" in kind) or ("7" in kind):
            max_tile_rows = 16384           # 8 MiB tiles on v6e / v7x
        n = getattr(dev, "num_cores", None)
        if isinstance(n, int) and n >= 2:
            cores = 2
        elif "7" in kind:                   # v7x: 2 TensorCores per chip
            cores = 2
    except Exception:
        pass
    return max_tile_rows, cores


def _reduce_kernel(x_ref, o_ref, *, steps_per_part, last_block, rem_rows, tile_rows):
    k = pl.program_id(1)

    # o_ref is the same (ACC_ROWS, 128) block for every step along the
    # reduction (last) grid axis -> resident vector-shaped accumulator.
    @pl.when(k == 0)
    def _init():
        o_ref[...] = jnp.zeros_like(o_ref)

    def _accum(x):
        # Fold the (tile_rows,128) tile into 8 independent vreg chains feeding
        # the (64,128) accumulator: pure VPU adds, good ILP, no XLU reduce.
        o_ref[...] += jnp.sum(x.reshape(-1, ACC_ROWS, LANES), axis=0)

    if rem_rows == 0:
        # Clean path: every block is fully in range.
        _accum(x_ref[...].astype(jnp.float32))
    else:
        blk = pl.program_id(0) * steps_per_part + k

        @pl.when(blk != last_block)
        def _full():
            _accum(x_ref[...].astype(jnp.float32))

        @pl.when(blk == last_block)
        def _partial():
            # Boundary block: DMA was clamped, rows >= rem_rows hold garbage.
            x = x_ref[...].astype(jnp.float32)
            row_ids = jax.lax.broadcasted_iota(jnp.int32, (tile_rows, LANES), 0)
            _accum(jnp.where(row_ids < rem_rows, x, 0.0))


def reduce_sum_dtype(a):
    """torch.sum(a, dtype=torch.float32): full reduction, float32 accumulation."""
    # TODO(synk): no native f64 on TPU; torch casts to f32 before reducing anyway.
    if a.dtype == jnp.float64:
        a = a.astype(jnp.float32)

    n = a.size
    flat = a.reshape(-1)  # bitcast for contiguous inputs

    # Small-input fast path: pallas_call launch/pipeline prologue would dominate.
    if n < FAST_PATH_ELEMS:
        return jnp.sum(flat.astype(jnp.float32))

    max_tile_rows, cores = _device_info()

    # Whole-row, lane-dense prefix; sum the (<128-element) lane tail separately
    # instead of padding the full flattened tensor.
    rows = n // LANES
    main_n = rows * LANES
    tail_sum = jnp.float32(0.0)
    if main_n != n:
        tail_sum = jnp.sum(flat[main_n:].astype(jnp.float32))
        flat = flat[:main_n]
    x2d = flat.reshape(rows, LANES)

    tile_rows = min(max_tile_rows, _round_up(rows, ACC_ROWS))
    steps = pl.cdiv(rows, tile_rows)
    rem_rows = rows % tile_rows   # valid rows in the clamped final block (0 = exact)

    # Megacore split only when the chip really has 2 TensorCores and the split
    # is even; v5e/v6e keep a single part (no useless serial outer loop).
    parts = 2 if (cores >= 2 and steps >= 2 and steps % 2 == 0) else 1
    steps_per_part = steps // parts

    kernel = functools.partial(
        _reduce_kernel,
        steps_per_part=steps_per_part,
        last_block=steps - 1,
        rem_rows=rem_rows,
        tile_rows=tile_rows,
    )

    partials = pl.pallas_call(
        kernel,
        out_shape=jax.ShapeDtypeStruct((parts * ACC_ROWS, LANES), jnp.float32),
        grid_spec=pltpu.PrefetchScalarGridSpec(
            num_scalar_prefetch=0,
            grid=(parts, steps_per_part),
            in_specs=[
                pl.BlockSpec(
                    (tile_rows, LANES),
                    lambda p, k: (p * steps_per_part + k, 0),
                ),
            ],
            # One resident (64, 128) partial-sum block per parallel part.
            out_specs=pl.BlockSpec((ACC_ROWS, LANES), lambda p, k: (p, 0)),
        ),
        compiler_params=pltpu.CompilerParams(
            dimension_semantics=("parallel", "arbitrary"),
            vmem_limit_bytes=32 * 1024 * 1024,
        ),
    )(x2d)

    # Tiny epilogue: reduce the (parts*64, 128) partials to a 0-d float32.
    return jnp.sum(partials) + tail_sum


if __name__ == "__main__":
    key = jax.random.PRNGKey(0)
    k1, k2, k3, k4 = jax.random.split(key, 4)

    # Rank-3 inputs (module annotates float64; float32 used here - see TODO).
    examples = [
        jax.random.normal(k1, (4, 9, 13), dtype=jnp.float32),      # tiny ragged -> fast path
        jax.random.normal(k2, (32, 130, 128), dtype=jnp.float32),  # clean single-tile Pallas path
        jax.random.normal(k3, (40, 520, 128), dtype=jnp.float32),  # multi-step + masked boundary block
        jax.random.normal(k4, (17, 100, 129), dtype=jnp.float32),  # lane tail + masked block
    ]

    for x in examples:
        got = reduce_sum_dtype(x)
        jax.block_until_ready(got)
        ref = jnp.sum(x.astype(jnp.float32))
        assert got.dtype == jnp.float32, got.dtype
        assert got.shape == (), got.shape
        assert jnp.allclose(got, ref, rtol=1e-5, atol=1e-6 * x.size), (got, ref)

    print("KERNEL_OK")
</pallas_src>

<mosaic_0001>
module attributes {stable_mosaic.version = 11 : i64} {
  func.func @_reduce_kernel(%arg0: i32, %arg1: i32, %arg2: memref<4160x128xf32, #tpu.memory_space<vmem>>, %arg3: memref<64x128xf32, #tpu.memory_space<vmem>>) attributes {dimension_semantics = [#tpu.dimension_semantics<parallel>, #tpu.dimension_semantics<arbitrary>], iteration_bounds = array<i64: 1, 1>, scalar_prefetch = 0 : i64, scratch_operands = 0 : i64, tpu.core_type = #tpu.core_type<tc>, window_params = [{transform_indices = @transform_0, window_bounds = array<i64: 4160, 128>}, {transform_indices = @transform_1, window_bounds = array<i64: 64, 128>}]} {
    %c0_i32 = arith.constant 0 : i32
    %0 = arith.cmpi eq, %arg1, %c0_i32 : i32
    %1 = arith.extui %0 : i1 to i32
    %c0_i32_0 = arith.constant 0 : i32
    %2 = arith.cmpi ne, %1, %c0_i32_0 : i32
    scf.if %2 {
      %cst_6 = arith.constant 0.000000e+00 : f32
      %9 = vector.broadcast %cst_6 : f32 to vector<64x128xf32>
      %c0_7 = arith.constant 0 : index
      %c0_8 = arith.constant 0 : index
      %10 = vector.load %arg3[%c0_7, %c0_8] : memref<64x128xf32, #tpu.memory_space<vmem>>, vector<64x128xf32>
      tpu.vector_store %arg3[%c0_7, %c0_8], %9 {strides = array<i32>} : memref<64x128xf32, #tpu.memory_space<vmem>>, vector<64x128xf32>,
    } else {
    }
    %c0 = arith.constant 0 : index
    %c0_1 = arith.constant 0 : index
    %3 = vector.load %arg2[%c0, %c0_1] : memref<4160x128xf32, #tpu.memory_space<vmem>>, vector<4160x128xf32>
    %c0_2 = arith.constant 0 : index
    %c0_3 = arith.constant 0 : index
    %4 = vector.load %arg3[%c0_2, %c0_3] : memref<64x128xf32, #tpu.memory_space<vmem>>, vector<64x128xf32>
    %5 = vector.shape_cast %3 : vector<4160x128xf32> to vector<65x64x128xf32>
    %cst = arith.constant dense<0.000000e+00> : vector<64x128xf32>
    %6 = vector.multi_reduction <add>, %5, %cst [0] : vector<65x64x128xf32> to vector<64x128xf32>
    %7 = arith.addf %4, %6 : vector<64x128xf32>
    %c0_4 = arith.constant 0 : index
    %c0_5 = arith.constant 0 : index
    %8 = vector.load %arg3[%c0_4, %c0_5] : memref<64x128xf32, #tpu.memory_space<vmem>>, vector<64x128xf32>
    tpu.vector_store %arg3[%c0_4, %c0_5], %7 {strides = array<i32>} : memref<64x128xf32, #tpu.memory_space<vmem>>, vector<64x128xf32>,
    return
  }
  func.func @transform_0(%arg0: i32, %arg1: i32) -> (i32, i32) {
    %c1_i32 = arith.constant 1 : i32
    %0 = arith.muli %arg0, %c1_i32 : i32
    %1 = arith.addi %0, %arg1 : i32
    %c0_i32 = arith.constant 0 : i32
    %c0_i32_0 = arith.constant 0 : i32
    return %1, %c0_i32 : i32, i32
  }
  func.func @transform_1(%arg0: i32, %arg1: i32) -> (i32, i32) {
    %c0_i32 = arith.constant 0 : i32
    %c0_i32_0 = arith.constant 0 : i32
    return %arg0, %c0_i32 : i32, i32
  }
}

</mosaic_0001>

<bundles_post_ra>
// kernel: tpu_custom_call.1
= control target key start
LH: loop header
LB: loop body
LE: loop exit
PB: predicated region body
PF: predicated region fallthrough
CT: control target
= control target key end

     0   :  { %6 = vsyncpa [#allocation3], 0  ;;  %s1211_s0 = inlined_call_operand.hbm [shape: f32[4160,128], index: 0, kind: input, shape index: {}]   ;;  %s1212_s1 = inlined_call_operand.hbm [shape: f32[64,128], index: 1, kind: output, shape index: {}]  }
   0x1   :  { %7 = vsyncpa [#allocation4], 0  ;;  %s1167_s6 = smov [#allocation2]   ;;  %s1119_s10 = scalar_lea.hbm %s1211_s0, 66560 }
   0x2   :  { %s17_s7 = sshll.u32 %s1167_s6, 4  ;;  %p1120_p0 = scmp.ne.s32.totalorder %s1211_s0, %s1119_s10  ;;  %s18_s7 = int_to_ptr.vmem [resolvable:$true] %s17_s7 }
   0x3   :  { %p1123_p1 = scmp.lt.u32.totalorder %s1119_s10, %s1211_s0 }
   0x5   :  { %p1125_p2 = pnand %p1123_p1, %p1120_p0 }
   0x7   :  { %1128 = shalt.err (!%p1125_p2)
}
   0x8   :  { %s1129_s15 = scalar_lea.vmem %s18_s7, 66560  ;;  %p1134_p4 = scmp.lt.s32.totalorder %s18_s7, %s18_s7 }
   0x9   :  { %p1130_p3 = scmp.ne.s32.totalorder %s18_s7, %s1129_s15  ;;  %p1135_p5 = scmp.lt.s32.totalorder %s1129_s15, %s1129_s15 }
   0xb   :  { %p1136_p6 = por %p1135_p5, %p1134_p4 }
   0xd   :  { %p1137_p7 = pnand %p1136_p6, %p1130_p3 }
   0xf   :  { %1140 = shalt.err (!%p1137_p7)
}
  0x10   :  { %s1168_s16 = smov 128   ;;  %s1169_s17 = smov 8  }
  0x11   :  { %23 = dma.hbm_to_vmem [thread:$0]  %s1211_s0, 66560, %s18_s7, [#allocation3], %s1168_s16, %s1168_s16, %s1169_s17  }
  0x12   :  { %1163 = dma.done.wait [#allocation3], 66560  }
  0x13   :  { %1164 = vsyncadd [#allocation3], 4294900736  ;;  %v41_v0 = vld [vmem:[#allocation2] sm:$0xff]  ;;  %v42_v24 = vld [vmem:[#allocation2 + $0x8] sm:$0xff]  ;;  %s1170_s0 = smov [#allocation5]  }
  0x14   :  { %v49_v1 = vld [vmem:[#allocation2 + $0x40] sm:$0xff]  ;;  %v50_v26 = vld [vmem:[#allocation2 + $0x48] sm:$0xff]  ;;  %s1102_s20 = sshll.u32 %s1170_s0, 4  ;;  %s1103_s20 = int_to_ptr.vmem [resolvable:$true] %s1102_s20 }
  0x15   :  { %v57_v2 = vld [vmem:[#allocation2 + $0x80] sm:$0xff]  ;;  %v569_v3 = vadd.f32 %v49_v1, %v41_v0  ;;  %v58_v27 = vld [vmem:[#allocation2 + $0x88] sm:$0xff]  ;;  %v633_v29 = vadd.f32 %v50_v26, %v42_v24  ;;  %v83_v26 = vld [vmem:[#allocation2 + $0x150] sm:$0xff]  ;;  %s1141_s21 = scalar_lea.vmem %s1103_s20, 1024  ;;  %p1146_p9 = scmp.lt.s32.totalorder %s1103_s20, %s1103_s20 }
  0x16   :  { %v65_v4 = vld [vmem:[#allocation2 + $0xc0] sm:$0xff]  ;;  %v66_v31 = vld [vmem:[#allocation2 + $0xc8] sm:$0xff]  ;;  %p1142_p8 = scmp.ne.s32.totalorder %s1103_s20, %s1141_s21  ;;  %p1147_p10 = scmp.lt.s32.totalorder %s1141_s21, %s1141_s21 }
  0x17   :  { %v570_v5 = vadd.f32 %v569_v3, %v57_v2  ;;  %v73_v6 = vld [vmem:[#allocation2 + $0x100] sm:$0xff]  ;;  %v634_v33 = vadd.f32 %v633_v29, %v58_v27  ;;  %v74_v35 = vld [vmem:[#allocation2 + $0x108] sm:$0xff] }
  0x18   :  { %v81_v8 = vld [vmem:[#allocation2 + $0x140] sm:$0xff]  ;;  %v82_v39 = vld [vmem:[#allocation2 + $0x148] sm:$0xff]  ;;  %p1148_p11 = por %p1147_p10, %p1146_p9 }
  0x19   :  { %v571_v7 = vadd.f32 %v570_v5, %v65_v4  ;;  %v89_v10 = vld [vmem:[#allocation2 + $0x180] sm:$0xff]  ;;  %v635_v37 = vadd.f32 %v634_v33, %v66_v31  ;;  %v90_v43 = vld [vmem:[#allocation2 + $0x188] sm:$0xff] }
  0x1a   :  { %v97_v12 = vld [vmem:[#allocation2 + $0x1c0] sm:$0xff]  ;;  %v98_v47 = vld [vmem:[#allocation2 + $0x1c8] sm:$0xff]  ;;  %p1149_p12 = pnand %p1148_p11, %p1142_p8 }
  0x1b   :  { %v572_v9 = vadd.f32 %v571_v7, %v73_v6  ;;  %v105_v14 = vld [vmem:[#allocation2 + $0x200] sm:$0xff]  ;;  %v636_v41 = vadd.f32 %v635_v37, %v74_v35  ;;  %v106_v51 = vld [vmem:[#allocation2 + $0x208] sm:$0xff]  ;;  %v43_v6 = vld [vmem:[#allocation2 + $0x10] sm:$0xff] }
  0x1c   :  { %v113_v16 = vld [vmem:[#allocation2 + $0x240] sm:$0xff]  ;;  %v114_v55 = vld [vmem:[#allocation2 + $0x248] sm:$0xff]  ;;  %v51_v7 = vld [vmem:[#allocation2 + $0x50] sm:$0xff] }
  0x1d   :  { %v573_v11 = vadd.f32 %v572_v9, %v81_v8  ;;  %v121_v18 = vld [vmem:[#allocation2 + $0x280] sm:$0xff]  ;;  %v637_v45 = vadd.f32 %v636_v41, %v82_v39  ;;  %v122_v59 = vld [vmem:[#allocation2 + $0x288] sm:$0xff] }
  0x1e   :  { %v129_v20 = vld [vmem:[#allocation2 + $0x2c0] sm:$0xff]  ;;  %v130_v63 = vld [vmem:[#allocation2 + $0x2c8] sm:$0xff] }
  0x1f   :  { %v574_v13 = vadd.f32 %v573_v11, %v89_v10  ;;  %v137_v22 = vld [vmem:[#allocation2 + $0x300] sm:$0xff]  ;;  %v638_v49 = vadd.f32 %v637_v45, %v90_v43  ;;  %v138_v3 = vld [vmem:[#allocation2 + $0x308] sm:$0xff]  ;;  %v59_v10 = vld [vmem:[#allocation2 + $0x90] sm:$0xff]  ;;  %v697_v11 = vadd.f32 %v51_v7, %v43_v6 }
  0x20   :  { %v145_v25 = vld [vmem:[#allocation2 + $0x340] sm:$0xff]  ;;  %v146_v9 = vld [vmem:[#allocation2 + $0x348] sm:$0xff]  ;;  %v147_v7 = vld [vmem:[#allocation2 + $0x350] sm:$0xff] }
  0x21   :  { %v575_v15 = vadd.f32 %v574_v13, %v97_v12  ;;  %v153_v30 = vld [vmem:[#allocation2 + $0x380] sm:$0xff]  ;;  %v639_v53 = vadd.f32 %v638_v49, %v98_v47  ;;  %v226_v6 = vld [vmem:[#allocation2 + $0x5c8] sm:$0xff] }
  0x22   :  { %v161_v34 = vld [vmem:[#allocation2 + $0x3c0] sm:$0xff] }
  0x23   :  { %v576_v17 = vadd.f32 %v575_v15, %v105_v14  ;;  %v169_v38 = vld [vmem:[#allocation2 + $0x400] sm:$0xff]  ;;  %v640_v57 = vadd.f32 %v639_v53, %v106_v51  ;;  %v67_v14 = vld [vmem:[#allocation2 + $0xd0] sm:$0xff] }
  0x24   :  { %v177_v42 = vld [vmem:[#allocation2 + $0x440] sm:$0xff] }
  0x25   :  { %v577_v19 = vadd.f32 %v576_v17, %v113_v16  ;;  %v185_v46 = vld [vmem:[#allocation2 + $0x480] sm:$0xff]  ;;  %v641_v61 = vadd.f32 %v640_v57, %v114_v55  ;;  %v154_v16 = vld [vmem:[#allocation2 + $0x388] sm:$0xff]  ;;  %v698_v17 = vadd.f32 %v697_v11, %v59_v10  ;;  %v44_v11 = vld [vmem:[#allocation2 + $0x18] sm:$0xff] }
  0x26   :  { %v193_v50 = vld [vmem:[#allocation2 + $0x4c0] sm:$0xff] }
  0x27   :  { %v578_v21 = vadd.f32 %v577_v19, %v121_v18  ;;  %v201_v54 = vld [vmem:[#allocation2 + $0x500] sm:$0xff]  ;;  %v642_v1 = vadd.f32 %v641_v61, %v122_v59 }
  0x28   :  { %v209_v58 = vld [vmem:[#allocation2 + $0x540] sm:$0xff] }
  0x29   :  { %v579_v23 = vadd.f32 %v578_v21, %v129_v20  ;;  %v217_v62 = vld [vmem:[#allocation2 + $0x580] sm:$0xff]  ;;  %v643_v5 = vadd.f32 %v642_v1, %v130_v63  ;;  %v75_v20 = vld [vmem:[#allocation2 + $0x110] sm:$0xff] }
  0x2a   :  { %v225_v2 = vld [vmem:[#allocation2 + $0x5c0] sm:$0xff] }
  0x2b   :  { %v580_v28 = vadd.f32 %v579_v23, %v137_v22  ;;  %v233_v8 = vld [vmem:[#allocation2 + $0x600] sm:$0xff]  ;;  %v644_v13 = vadd.f32 %v643_v5, %v138_v3  ;;  %v162_v22 = vld [vmem:[#allocation2 + $0x3c8] sm:$0xff]  ;;  %v699_v23 = vadd.f32 %v698_v17, %v67_v14 }
  0x2c   :  { %v241_v15 = vld [vmem:[#allocation2 + $0x640] sm:$0xff] }
  0x2d   :  { %v581_v32 = vadd.f32 %v580_v28, %v145_v25  ;;  %v645_v19 = vadd.f32 %v644_v13, %v146_v9  ;;  %v249_v21 = vld [vmem:[#allocation2 + $0x680] sm:$0xff]  ;;  %v170_v28 = vld [vmem:[#allocation2 + $0x408] sm:$0xff]  ;;  %v700_v29 = vadd.f32 %v699_v23, %v75_v20  ;;  %v60_v13 = vld [vmem:[#allocation2 + $0x98] sm:$0xff] }
  0x2e   :  { %v257_v27 = vld [vmem:[#allocation2 + $0x6c0] sm:$0xff]  ;;  %v155_v20 = vld [vmem:[#allocation2 + $0x390] sm:$0xff]  ;;  %v242_v23 = vld [vmem:[#allocation2 + $0x648] sm:$0xff] }
  0x2f   :  { %v582_v36 = vadd.f32 %v581_v32, %v153_v30  ;;  %v646_v25 = vadd.f32 %v645_v19, %v154_v16  ;;  %v91_v32 = vld [vmem:[#allocation2 + $0x190] sm:$0xff]  ;;  %v265_v33 = vld [vmem:[#allocation2 + $0x700] sm:$0xff]  ;;  %v701_v35 = vadd.f32 %v700_v29, %v83_v26  ;;  %v76_v29 = vld [vmem:[#allocation2 + $0x118] sm:$0xff] }
  0x30   :  { %v273_v39 = vld [vmem:[#allocation2 + $0x740] sm:$0xff] }
  0x31   :  { %v583_v40 = vadd.f32 %v582_v36, %v161_v34  ;;  %v647_v31 = vadd.f32 %v646_v25, %v162_v22  ;;  %v178_v34 = vld [vmem:[#allocation2 + $0x448] sm:$0xff]  ;;  %v702_v41 = vadd.f32 %v701_v35, %v91_v32  ;;  %v281_v45 = vld [vmem:[#allocation2 + $0x780] sm:$0xff] }
  0x32   :  { %v289_v51 = vld [vmem:[#allocation2 + $0x7c0] sm:$0xff] }
  0x33   :  { %v584_v44 = vadd.f32 %v583_v40, %v169_v38  ;;  %v648_v37 = vadd.f32 %v647_v31, %v170_v28  ;;  %v99_v38 = vld [vmem:[#allocation2 + $0x1d0] sm:$0xff]  ;;  %v186_v40 = vld [vmem:[#allocation2 + $0x488] sm:$0xff]  ;;  %v297_v57 = vld [vmem:[#allocation2 + $0x800] sm:$0xff] }
  0x34   :  { %v703_v47 = vadd.f32 %v702_v41, %v99_v38  ;;  %v305_v63 = vld [vmem:[#allocation2 + $0x840] sm:$0xff]  ;;  %v163_v28 = vld [vmem:[#allocation2 + $0x3d0] sm:$0xff]  ;;  %v250_v31 = vld [vmem:[#allocation2 + $0x688] sm:$0xff] }
  0x35   :  { %v585_v48 = vadd.f32 %v584_v44, %v177_v42  ;;  %v649_v43 = vadd.f32 %v648_v37, %v178_v34  ;;  %v107_v44 = vld [vmem:[#allocation2 + $0x210] sm:$0xff]  ;;  %v313_v5 = vld [vmem:[#allocation2 + $0x880] sm:$0xff]  ;;  %v84_v37 = vld [vmem:[#allocation2 + $0x158] sm:$0xff] }
  0x36   :  { %v704_v53 = vadd.f32 %v703_v47, %v107_v44  ;;  %v321_v14 = vld [vmem:[#allocation2 + $0x8c0] sm:$0xff]  ;;  %v179_v44 = vld [vmem:[#allocation2 + $0x450] sm:$0xff]  ;;  %v266_v47 = vld [vmem:[#allocation2 + $0x708] sm:$0xff] }
  0x37   :  { %v586_v52 = vadd.f32 %v585_v48, %v185_v46  ;;  %v194_v46 = vld [vmem:[#allocation2 + $0x4c8] sm:$0xff]  ;;  %v650_v49 = vadd.f32 %v649_v43, %v186_v40  ;;  %v329_v22 = vld [vmem:[#allocation2 + $0x900] sm:$0xff] }
  0x38   :  { %v345_v38 = vld [vmem:[#allocation2 + $0x980] sm:$0xff] }
  0x39   :  { %v587_v56 = vadd.f32 %v586_v52, %v193_v50  ;;  %v115_v50 = vld [vmem:[#allocation2 + $0x250] sm:$0xff]  ;;  %v202_v52 = vld [vmem:[#allocation2 + $0x508] sm:$0xff]  ;;  %v651_v55 = vadd.f32 %v650_v49, %v194_v46  ;;  %v353_v46 = vld [vmem:[#allocation2 + $0x9c0] sm:$0xff] }
  0x3a   :  { %v705_v59 = vadd.f32 %v704_v53, %v115_v50  ;;  %v100_v53 = vld [vmem:[#allocation2 + $0x1d8] sm:$0xff] }
  0x3b   :  { %v588_v60 = vadd.f32 %v587_v56, %v201_v54  ;;  %v123_v56 = vld [vmem:[#allocation2 + $0x290] sm:$0xff]  ;;  %v652_v61 = vadd.f32 %v651_v55, %v202_v52  ;;  %v274_v55 = vld [vmem:[#allocation2 + $0x748] sm:$0xff] }
  0x3c   :  { %v706_v1 = vadd.f32 %v705_v59, %v123_v56  ;;  %v187_v52 = vld [vmem:[#allocation2 + $0x490] sm:$0xff] }
  0x3d   :  { %v589_v0 = vadd.f32 %v588_v60, %v209_v58  ;;  %v210_v58 = vld [vmem:[#allocation2 + $0x548] sm:$0xff] }
  0x3e   :  { %v653_v3 = vadd.f32 %v652_v61, %v210_v58  ;;  %v108_v61 = vld [vmem:[#allocation2 + $0x218] sm:$0xff] }
  0x3f   :  { %v590_v4 = vadd.f32 %v589_v0, %v217_v62  ;;  %v131_v62 = vld [vmem:[#allocation2 + $0x2d0] sm:$0xff]  ;;  %v218_v0 = vld [vmem:[#allocation2 + $0x588] sm:$0xff] }
  0x40   :  { %v654_v10 = vadd.f32 %v653_v3, %v218_v0 }
  0x41   :  { %v591_v12 = vadd.f32 %v590_v4, %v225_v2  ;;  %v139_v4 = vld [vmem:[#allocation2 + $0x310] sm:$0xff] }
  0x42   :  { %v655_v19 = vadd.f32 %v654_v10, %v226_v6  ;;  %v377_v6 = vld [vmem:[#allocation2 + $0xa80] sm:$0xff] }
  0x43   :  { %v592_v18 = vadd.f32 %v591_v12, %v233_v8  ;;  %v707_v8 = vadd.f32 %v706_v1, %v131_v62  ;;  %v52_v12 = vld [vmem:[#allocation2 + $0x58] sm:$0xff]  ;;  %v369_v62 = vld [vmem:[#allocation2 + $0xa40] sm:$0xff] }
  0x44   :  { %v761_v17 = vadd.f32 %v52_v12, %v44_v11  ;;  %v211_v12 = vld [vmem:[#allocation2 + $0x550] sm:$0xff] }
  0x45   :  { %v593_v24 = vadd.f32 %v592_v18, %v241_v15  ;;  %v234_v15 = vld [vmem:[#allocation2 + $0x608] sm:$0xff]  ;;  %v708_v16 = vadd.f32 %v707_v8, %v139_v4  ;;  %v203_v4 = vld [vmem:[#allocation2 + $0x510] sm:$0xff] }
  0x46   :  { %v762_v25 = vadd.f32 %v761_v17, %v60_v13  ;;  %v124_v13 = vld [vmem:[#allocation2 + $0x298] sm:$0xff] }
  0x47   :  { %v594_v30 = vadd.f32 %v593_v24, %v249_v21  ;;  %v68_v21 = vld [vmem:[#allocation2 + $0xd8] sm:$0xff]  ;;  %v709_v24 = vadd.f32 %v708_v16, %v147_v7  ;;  %v290_v7 = vld [vmem:[#allocation2 + $0x7c8] sm:$0xff] }
  0x49   :  { %v595_v36 = vadd.f32 %v594_v30, %v257_v27  ;;  %v656_v27 = vadd.f32 %v655_v19, %v234_v15  ;;  %v337_v30 = vld [vmem:[#allocation2 + $0x940] sm:$0xff]  ;;  %v710_v32 = vadd.f32 %v709_v24, %v155_v20  ;;  %v298_v15 = vld [vmem:[#allocation2 + $0x808] sm:$0xff]  ;;  %v219_v20 = vld [vmem:[#allocation2 + $0x590] sm:$0xff] }
  0x4b   :  { %v596_v42 = vadd.f32 %v595_v36, %v265_v33  ;;  %v763_v33 = vadd.f32 %v762_v25, %v68_v21  ;;  %v657_v35 = vadd.f32 %v656_v27, %v242_v23  ;;  %v171_v36 = vld [vmem:[#allocation2 + $0x410] sm:$0xff]  ;;  %v711_v40 = vadd.f32 %v710_v32, %v163_v28  ;;  %v132_v21 = vld [vmem:[#allocation2 + $0x2d8] sm:$0xff]  ;;  %v306_v23 = vld [vmem:[#allocation2 + $0x848] sm:$0xff] }
  0x4c   :  { %v235_v32 = vld [vmem:[#allocation2 + $0x610] sm:$0xff] }
  0x4d   :  { %v597_v48 = vadd.f32 %v596_v42, %v273_v39  ;;  %v258_v39 = vld [vmem:[#allocation2 + $0x6c8] sm:$0xff]  ;;  %v764_v41 = vadd.f32 %v763_v33, %v76_v29  ;;  %v658_v43 = vadd.f32 %v657_v35, %v250_v31  ;;  %v227_v29 = vld [vmem:[#allocation2 + $0x5d0] sm:$0xff]  ;;  %v45_v35 = vld [vmem:[#allocation2 + $0x20] sm:$0xff] }
  0x4e   :  { %v314_v31 = vld [vmem:[#allocation2 + $0x888] sm:$0xff] }
  0x4f   :  { %v598_v54 = vadd.f32 %v597_v48, %v281_v45  ;;  %v92_v45 = vld [vmem:[#allocation2 + $0x198] sm:$0xff]  ;;  %v712_v48 = vadd.f32 %v711_v40, %v171_v36  ;;  %v765_v49 = vadd.f32 %v764_v41, %v84_v37  ;;  %v61_v40 = vld [vmem:[#allocation2 + $0xa0] sm:$0xff] }
  0x50   :  { %v409_v41 = vld [vmem:[#allocation2 + $0xb80] sm:$0xff] }
  0x51   :  { %v599_v60 = vadd.f32 %v598_v54, %v289_v51  ;;  %v659_v51 = vadd.f32 %v658_v43, %v258_v39  ;;  %v361_v54 = vld [vmem:[#allocation2 + $0xa00] sm:$0xff]  ;;  %v713_v56 = vadd.f32 %v712_v48, %v179_v44  ;;  %v243_v48 = vld [vmem:[#allocation2 + $0x650] sm:$0xff] }
  0x52   :  { %v53_v39 = vld [vmem:[#allocation2 + $0x60] sm:$0xff] }
  0x53   :  { %v600_v2 = vadd.f32 %v599_v60, %v297_v57  ;;  %v766_v57 = vadd.f32 %v765_v49, %v92_v45  ;;  %v660_v59 = vadd.f32 %v659_v51, %v266_v47  ;;  %v195_v60 = vld [vmem:[#allocation2 + $0x4d0] sm:$0xff]  ;;  %v714_v0 = vadd.f32 %v713_v56, %v187_v52  ;;  %v156_v49 = vld [vmem:[#allocation2 + $0x398] sm:$0xff]  ;;  %v417_v51 = vld [vmem:[#allocation2 + $0xbc0] sm:$0xff] }
  0x54   :  { %v825_v45 = vadd.f32 %v53_v39, %v45_v35  ;;  %v330_v52 = vld [vmem:[#allocation2 + $0x908] sm:$0xff]  ;;  %v196_v35 = vld [vmem:[#allocation2 + $0x4d8] sm:$0xff] }
  0x55   :  { %v601_v9 = vadd.f32 %v600_v2, %v305_v63  ;;  %v282_v63 = vld [vmem:[#allocation2 + $0x788] sm:$0xff]  ;;  %v767_v1 = vadd.f32 %v766_v57, %v100_v53  ;;  %v661_v3 = vadd.f32 %v660_v59, %v274_v55  ;;  %v715_v8 = vadd.f32 %v714_v0, %v195_v60  ;;  %v164_v59 = vld [vmem:[#allocation2 + $0x3d8] sm:$0xff]  ;;  %v77_v60 = vld [vmem:[#allocation2 + $0x120] sm:$0xff] }
  0x56   :  { %v826_v55 = vadd.f32 %v825_v45, %v61_v40  ;;  %v204_v45 = vld [vmem:[#allocation2 + $0x518] sm:$0xff] }
  0x57   :  { %v602_v18 = vadd.f32 %v601_v9, %v313_v5  ;;  %v116_v5 = vld [vmem:[#allocation2 + $0x258] sm:$0xff]  ;;  %v768_v9 = vadd.f32 %v767_v1, %v108_v61  ;;  %v662_v11 = vadd.f32 %v661_v3, %v282_v63  ;;  %v716_v16 = vadd.f32 %v715_v8, %v203_v4  ;;  %v425_v61 = vld [vmem:[#allocation2 + $0xc00] sm:$0xff]  ;;  %v259_v4 = vld [vmem:[#allocation2 + $0x6d0] sm:$0xff] }
  0x58   :  { %v346_v8 = vld [vmem:[#allocation2 + $0x988] sm:$0xff] }
  0x59   :  { %v603_v26 = vadd.f32 %v602_v18, %v321_v14  ;;  %v385_v14 = vld [vmem:[#allocation2 + $0xac0] sm:$0xff]  ;;  %v769_v17 = vadd.f32 %v768_v9, %v116_v5  ;;  %v663_v19 = vadd.f32 %v662_v11, %v290_v7  ;;  %v717_v24 = vadd.f32 %v716_v16, %v211_v12  ;;  %v172_v5 = vld [vmem:[#allocation2 + $0x418] sm:$0xff] }
  0x5a   :  { %v433_v7 = vld [vmem:[#allocation2 + $0xc40] sm:$0xff] }
  0x5b   :  { %v604_v34 = vadd.f32 %v603_v26, %v329_v22  ;;  %v393_v22 = vld [vmem:[#allocation2 + $0xb00] sm:$0xff]  ;;  %v770_v25 = vadd.f32 %v769_v17, %v124_v13  ;;  %v664_v28 = vadd.f32 %v663_v19, %v298_v15  ;;  %v718_v33 = vadd.f32 %v717_v24, %v219_v20  ;;  %v180_v15 = vld [vmem:[#allocation2 + $0x458] sm:$0xff]  ;;  %v275_v24 = vld [vmem:[#allocation2 + $0x750] sm:$0xff] }
  0x5c   :  { %v401_v26 = vld [vmem:[#allocation2 + $0xb40] sm:$0xff] }
  0x5d   :  { %v605_v42 = vadd.f32 %v604_v34, %v337_v30  ;;  %v140_v30 = vld [vmem:[#allocation2 + $0x318] sm:$0xff]  ;;  %v771_v34 = vadd.f32 %v770_v25, %v132_v21  ;;  %v665_v37 = vadd.f32 %v664_v28, %v306_v23  ;;  %v719_v43 = vadd.f32 %v718_v33, %v227_v29  ;;  %v93_v16 = vld [vmem:[#allocation2 + $0x1a0] sm:$0xff]  ;;  %v362_v28 = vld [vmem:[#allocation2 + $0xa08] sm:$0xff] }
  0x5e   :  { %v441_v17 = vld [vmem:[#allocation2 + $0xc80] sm:$0xff]  ;;  %v188_v25 = vld [vmem:[#allocation2 + $0x498] sm:$0xff] }
  0x5f   :  { %v606_v50 = vadd.f32 %v605_v42, %v345_v38  ;;  %v148_v38 = vld [vmem:[#allocation2 + $0x358] sm:$0xff]  ;;  %v322_v42 = vld [vmem:[#allocation2 + $0x8c8] sm:$0xff]  ;;  %v772_v44 = vadd.f32 %v771_v34, %v140_v30  ;;  %v666_v47 = vadd.f32 %v665_v37, %v314_v31  ;;  %v720_v53 = vadd.f32 %v719_v43, %v235_v32  ;;  %v283_v34 = vld [vmem:[#allocation2 + $0x790] sm:$0xff] }
  0x60   :  { %v457_v37 = vld [vmem:[#allocation2 + $0xd00] sm:$0xff] }
  0x61   :  { %v607_v58 = vadd.f32 %v606_v50, %v353_v46  ;;  %v69_v50 = vld [vmem:[#allocation2 + $0xe0] sm:$0xff]  ;;  %v667_v57 = vadd.f32 %v666_v47, %v322_v42  ;;  %v721_v63 = vadd.f32 %v720_v53, %v243_v48  ;;  %v378_v48 = vld [vmem:[#allocation2 + $0xa88] sm:$0xff] }
  0x62   :  { %v827_v1 = vadd.f32 %v826_v55, %v69_v50  ;;  %v465_v47 = vld [vmem:[#allocation2 + $0xd40] sm:$0xff]  ;;  %v212_v55 = vld [vmem:[#allocation2 + $0x558] sm:$0xff] }
  0x63   :  { %v608_v2 = vadd.f32 %v607_v58, %v361_v54  ;;  %v773_v54 = vadd.f32 %v772_v44, %v148_v38  ;;  %v251_v58 = vld [vmem:[#allocation2 + $0x690] sm:$0xff]  ;;  %v668_v3 = vadd.f32 %v667_v57, %v330_v52  ;;  %v370_v38 = vld [vmem:[#allocation2 + $0xa48] sm:$0xff]  ;;  %v473_v57 = vld [vmem:[#allocation2 + $0xd80] sm:$0xff] }
  0x64   :  { %v722_v9 = vadd.f32 %v721_v63, %v251_v58  ;;  %v828_v11 = vadd.f32 %v827_v1, %v77_v60  ;;  %v291_v44 = vld [vmem:[#allocation2 + $0x7d0] sm:$0xff]  ;;  %v481_v58 = vld [vmem:[#allocation2 + $0xdc0] sm:$0xff] }
  0x65   :  { %v609_v10 = vadd.f32 %v608_v2, %v369_v62  ;;  %v338_v62 = vld [vmem:[#allocation2 + $0x948] sm:$0xff]  ;;  %v774_v0 = vadd.f32 %v773_v54, %v156_v49  ;;  %v299_v54 = vld [vmem:[#allocation2 + $0x810] sm:$0xff] }
  0x66   :  { %v669_v13 = vadd.f32 %v668_v3, %v338_v62  ;;  %v723_v19 = vadd.f32 %v722_v9, %v259_v4  ;;  %v307_v1 = vld [vmem:[#allocation2 + $0x850] sm:$0xff]  ;;  %v133_v3 = vld [vmem:[#allocation2 + $0x2e0] sm:$0xff] }
  0x67   :  { %v610_v18 = vadd.f32 %v609_v10, %v377_v6  ;;  %v85_v6 = vld [vmem:[#allocation2 + $0x160] sm:$0xff]  ;;  %v775_v10 = vadd.f32 %v774_v0, %v164_v59  ;;  %v386_v59 = vld [vmem:[#allocation2 + $0xac8] sm:$0xff] }
  0x68   :  { %v829_v21 = vadd.f32 %v828_v11, %v85_v6  ;;  %v670_v23 = vadd.f32 %v669_v13, %v346_v8  ;;  %v489_v4 = vld [vmem:[#allocation2 + $0xe00] sm:$0xff]  ;;  %v402_v6 = vld [vmem:[#allocation2 + $0xb48] sm:$0xff]  ;;  %v228_v13 = vld [vmem:[#allocation2 + $0x5d8] sm:$0xff] }
  0x69   :  { %v611_v27 = vadd.f32 %v610_v18, %v385_v14  ;;  %v267_v14 = vld [vmem:[#allocation2 + $0x710] sm:$0xff]  ;;  %v354_v18 = vld [vmem:[#allocation2 + $0x9c8] sm:$0xff]  ;;  %v776_v20 = vadd.f32 %v775_v10, %v172_v5 }
  0x6a   :  { %v724_v29 = vadd.f32 %v723_v19, %v267_v14  ;;  %v830_v31 = vadd.f32 %v829_v21, %v93_v16  ;;  %v671_v33 = vadd.f32 %v670_v23, %v354_v18  ;;  %v394_v5 = vld [vmem:[#allocation2 + $0xb08] sm:$0xff]  ;;  %v141_v14 = vld [vmem:[#allocation2 + $0x320] sm:$0xff]  ;;  %v236_v23 = vld [vmem:[#allocation2 + $0x618] sm:$0xff] }
  0x6b   :  { %v612_v36 = vadd.f32 %v611_v27, %v393_v22  ;;  %v449_v27 = vld [vmem:[#allocation2 + $0xcc0] sm:$0xff]  ;;  %v777_v30 = vadd.f32 %v776_v20, %v180_v15  ;;  %v323_v15 = vld [vmem:[#allocation2 + $0x8d0] sm:$0xff]  ;;  %v46_v19 = vld [vmem:[#allocation2 + $0x28] sm:$0xff] }
  0x6c   :  { %v725_v39 = vadd.f32 %v724_v29, %v275_v24  ;;  %v672_v43 = vadd.f32 %v671_v33, %v362_v28  ;;  %v54_v20 = vld [vmem:[#allocation2 + $0x68] sm:$0xff]  ;;  %v149_v24 = vld [vmem:[#allocation2 + $0x360] sm:$0xff] }
  0x6d   :  { %v613_v46 = vadd.f32 %v612_v36, %v401_v26  ;;  %v101_v26 = vld [vmem:[#allocation2 + $0x1e0] sm:$0xff]  ;;  %v778_v40 = vadd.f32 %v777_v30, %v188_v25  ;;  %v62_v25 = vld [vmem:[#allocation2 + $0xa8] sm:$0xff] }
  0x6e   :  { %v109_v36 = vld [vmem:[#allocation2 + $0x220] sm:$0xff]  ;;  %v726_v49 = vadd.f32 %v725_v39, %v283_v34  ;;  %v673_v53 = vadd.f32 %v672_v43, %v370_v38  ;;  %v410_v28 = vld [vmem:[#allocation2 + $0xb88] sm:$0xff] }
  0x6f   :  { %v614_v56 = vadd.f32 %v613_v46, %v409_v41  ;;  %v831_v41 = vadd.f32 %v830_v31, %v101_v26  ;;  %v117_v46 = vld [vmem:[#allocation2 + $0x260] sm:$0xff]  ;;  %v779_v50 = vadd.f32 %v778_v40, %v196_v35  ;;  %v889_v26 = vadd.f32 %v54_v20, %v46_v19  ;;  %v331_v35 = vld [vmem:[#allocation2 + $0x910] sm:$0xff]  ;;  %v418_v40 = vld [vmem:[#allocation2 + $0xbc8] sm:$0xff] }
  0x70   :  { %v727_v60 = vadd.f32 %v726_v49, %v291_v44  ;;  %v674_v0 = vadd.f32 %v673_v53, %v378_v48  ;;  %v505_v39 = vld [vmem:[#allocation2 + $0xe80] sm:$0xff]  ;;  %v78_v44 = vld [vmem:[#allocation2 + $0x128] sm:$0xff]  ;;  %v252_v48 = vld [vmem:[#allocation2 + $0x698] sm:$0xff] }
  0x71   :  { %v615_v2 = vadd.f32 %v614_v56, %v417_v51  ;;  %v832_v51 = vadd.f32 %v831_v41, %v109_v36  ;;  %v125_v56 = vld [vmem:[#allocation2 + $0x2a0] sm:$0xff]  ;;  %v244_v36 = vld [vmem:[#allocation2 + $0x658] sm:$0xff]  ;;  %v890_v38 = vadd.f32 %v889_v26, %v62_v25  ;;  %v363_v19 = vld [vmem:[#allocation2 + $0xa10] sm:$0xff] }
  0x72   :  { %v675_v11 = vadd.f32 %v674_v0, %v386_v59  ;;  %v165_v49 = vld [vmem:[#allocation2 + $0x3e0] sm:$0xff]  ;;  %v347_v59 = vld [vmem:[#allocation2 + $0x990] sm:$0xff]  ;;  %v434_v0 = vld [vmem:[#allocation2 + $0xc48] sm:$0xff] }
  0x73   :  { %v616_v12 = vadd.f32 %v615_v2, %v425_v61  ;;  %v780_v61 = vadd.f32 %v779_v50, %v204_v45  ;;  %v833_v62 = vadd.f32 %v832_v51, %v117_v46  ;;  %v220_v2 = vld [vmem:[#allocation2 + $0x598] sm:$0xff]  ;;  %v513_v51 = vld [vmem:[#allocation2 + $0xec0] sm:$0xff] }
  0x74   :  { %v276_v20 = vld [vmem:[#allocation2 + $0x758] sm:$0xff] }
  0x75   :  { %v617_v22 = vadd.f32 %v616_v12, %v433_v7  ;;  %v728_v7 = vadd.f32 %v727_v60, %v299_v54  ;;  %v781_v8 = vadd.f32 %v780_v61, %v212_v55  ;;  %v834_v9 = vadd.f32 %v833_v62, %v125_v56  ;;  %v315_v12 = vld [vmem:[#allocation2 + $0x890] sm:$0xff]  ;;  %v86_v56 = vld [vmem:[#allocation2 + $0x168] sm:$0xff]  ;;  %v260_v60 = vld [vmem:[#allocation2 + $0x6d8] sm:$0xff] }
  0x76   :  { %v173_v61 = vld [vmem:[#allocation2 + $0x420] sm:$0xff] }
  0x77   :  { %v618_v32 = vadd.f32 %v617_v22, %v441_v17  ;;  %v729_v16 = vadd.f32 %v728_v7, %v307_v1  ;;  %v782_v17 = vadd.f32 %v781_v8, %v220_v2  ;;  %v835_v18 = vadd.f32 %v834_v9, %v133_v3  ;;  %v355_v7 = vld [vmem:[#allocation2 + $0x9d0] sm:$0xff]  ;;  %v268_v8 = vld [vmem:[#allocation2 + $0x718] sm:$0xff]  ;;  %v181_v9 = vld [vmem:[#allocation2 + $0x460] sm:$0xff] }
  0x78   :  { %v676_v22 = vadd.f32 %v675_v11, %v394_v5  ;;  %v529_v11 = vld [vmem:[#allocation2 + $0xf40] sm:$0xff] }
  0x79   :  { %v619_v42 = vadd.f32 %v618_v32, %v449_v27  ;;  %v497_v27 = vld [vmem:[#allocation2 + $0xe40] sm:$0xff]  ;;  %v730_v29 = vadd.f32 %v729_v16, %v315_v12  ;;  %v783_v30 = vadd.f32 %v782_v17, %v228_v13  ;;  %v836_v31 = vadd.f32 %v835_v18, %v141_v14  ;;  %v70_v32 = vld [vmem:[#allocation2 + $0xe8] sm:$0xff] }
  0x7a   :  { %v677_v34 = vadd.f32 %v676_v22, %v402_v6  ;;  %v891_v50 = vadd.f32 %v890_v38, %v70_v32  ;;  %v442_v12 = vld [vmem:[#allocation2 + $0xc88] sm:$0xff]  ;;  %v284_v32 = vld [vmem:[#allocation2 + $0x798] sm:$0xff] }
  0x7b   :  { %v620_v52 = vadd.f32 %v619_v42, %v457_v37  ;;  %v157_v37 = vld [vmem:[#allocation2 + $0x3a0] sm:$0xff]  ;;  %v731_v41 = vadd.f32 %v730_v29, %v323_v15  ;;  %v784_v42 = vadd.f32 %v783_v30, %v236_v23  ;;  %v837_v43 = vadd.f32 %v836_v31, %v149_v24  ;;  %v102_v16 = vld [vmem:[#allocation2 + $0x1e8] sm:$0xff]  ;;  %v371_v31 = vld [vmem:[#allocation2 + $0xa50] sm:$0xff] }
  0x7c   :  { %v678_v46 = vadd.f32 %v677_v34, %v410_v28  ;;  %v892_v62 = vadd.f32 %v891_v50, %v78_v44  ;;  %v537_v23 = vld [vmem:[#allocation2 + $0xf80] sm:$0xff]  ;;  %v450_v24 = vld [vmem:[#allocation2 + $0xcc8] sm:$0xff]  ;;  %v292_v44 = vld [vmem:[#allocation2 + $0x7d8] sm:$0xff] }
  0x7d   :  { %v621_v63 = vadd.f32 %v620_v52, %v465_v47  ;;  %v339_v47 = vld [vmem:[#allocation2 + $0x950] sm:$0xff]  ;;  %v426_v52 = vld [vmem:[#allocation2 + $0xc08] sm:$0xff]  ;;  %v732_v53 = vadd.f32 %v731_v41, %v331_v35  ;;  %v785_v54 = vadd.f32 %v784_v42, %v244_v36  ;;  %v838_v55 = vadd.f32 %v837_v43, %v157_v37  ;;  %v545_v35 = vld [vmem:[#allocation2 + $0xfc0] sm:$0xff] }
  0x7e   :  { %v110_v28 = vld [vmem:[#allocation2 + $0x228] sm:$0xff]  ;;  %v379_v43 = vld [vmem:[#allocation2 + $0xa90] sm:$0xff] }
  0x7f   :  { %v622_v10 = vadd.f32 %v621_v63, %v473_v57  ;;  %v521_v63 = vld [vmem:[#allocation2 + $0xf00] sm:$0xff]  ;;  %v733_v1 = vadd.f32 %v732_v53, %v339_v47  ;;  %v786_v2 = vadd.f32 %v785_v54, %v252_v48  ;;  %v839_v3 = vadd.f32 %v838_v55, %v165_v49  ;;  %v458_v36 = vld [vmem:[#allocation2 + $0xd08] sm:$0xff]  ;;  %v387_v55 = vld [vmem:[#allocation2 + $0xad0] sm:$0xff] }
  0x80   :  { %v553_v47 = vld [vmem:[#allocation2 + $0x1000] sm:$0xff]  ;;  %v466_v48 = vld [vmem:[#allocation2 + $0xd48] sm:$0xff] }
  0x81   :  { %v623_v21 = vadd.f32 %v622_v10, %v481_v58  ;;  %v679_v58 = vadd.f32 %v678_v46, %v418_v40  ;;  %v893_v10 = vadd.f32 %v892_v62, %v86_v56  ;;  %v734_v13 = vadd.f32 %v733_v1, %v347_v59  ;;  %v118_v40 = vld [vmem:[#allocation2 + $0x268] sm:$0xff]  ;;  %v300_v56 = vld [vmem:[#allocation2 + $0x818] sm:$0xff] }
  0x82   :  { %v787_v14 = vadd.f32 %v786_v2, %v260_v60  ;;  %v840_v15 = vadd.f32 %v839_v3, %v173_v61  ;;  %v474_v59 = vld [vmem:[#allocation2 + $0xd88] sm:$0xff]  ;;  %v395_v3 = vld [vmem:[#allocation2 + $0xb10] sm:$0xff] }
  0x83   :  { %v624_v33 = vadd.f32 %v623_v21, %v489_v4  ;;  %v94_v4 = vld [vmem:[#allocation2 + $0x1a8] sm:$0xff]  ;;  %v680_v6 = vadd.f32 %v679_v58, %v426_v52  ;;  %v189_v21 = vld [vmem:[#allocation2 + $0x4a0] sm:$0xff]  ;;  %v735_v25 = vadd.f32 %v734_v13, %v355_v7 }
  0x84   :  { %v894_v22 = vadd.f32 %v893_v10, %v94_v4  ;;  %v788_v26 = vadd.f32 %v787_v14, %v268_v8  ;;  %v126_v52 = vld [vmem:[#allocation2 + $0x2a8] sm:$0xff]  ;;  %v308_v4 = vld [vmem:[#allocation2 + $0x858] sm:$0xff]  ;;  %v403_v8 = vld [vmem:[#allocation2 + $0xb50] sm:$0xff] }
  0x85   :  { %v625_v45 = vadd.f32 %v624_v33, %v497_v27  ;;  %v681_v18 = vadd.f32 %v680_v6, %v434_v0  ;;  %v841_v27 = vadd.f32 %v840_v15, %v181_v9  ;;  %v197_v33 = vld [vmem:[#allocation2 + $0x4e0] sm:$0xff]  ;;  %v736_v37 = vadd.f32 %v735_v25, %v363_v19  ;;  %v482_v60 = vld [vmem:[#allocation2 + $0xdc8] sm:$0xff]  ;;  %v316_v14 = vld [vmem:[#allocation2 + $0x898] sm:$0xff] }
  0x86   :  { %v895_v34 = vadd.f32 %v894_v22, %v102_v16  ;;  %v789_v38 = vadd.f32 %v788_v26, %v276_v20  ;;  %v134_v0 = vld [vmem:[#allocation2 + $0x2e8] sm:$0xff]  ;;  %v229_v15 = vld [vmem:[#allocation2 + $0x5e0] sm:$0xff]  ;;  %v55_v22 = vld [vmem:[#allocation2 + $0x70] sm:$0xff] }
  0x87   :  { %v626_v57 = vadd.f32 %v625_v45, %v505_v39  ;;  %v682_v30 = vadd.f32 %v681_v18, %v442_v12  ;;  %v842_v39 = vadd.f32 %v841_v27, %v189_v21  ;;  %v205_v45 = vld [vmem:[#allocation2 + $0x520] sm:$0xff]  ;;  %v737_v49 = vadd.f32 %v736_v37, %v371_v31  ;;  %v490_v7 = vld [vmem:[#allocation2 + $0xe08] sm:$0xff]  ;;  %v47_v21 = vld [vmem:[#allocation2 + $0x30] sm:$0xff] }
  0x88   :  { %v896_v46 = vadd.f32 %v895_v34, %v110_v28  ;;  %v790_v50 = vadd.f32 %v789_v38, %v284_v32  ;;  %v142_v12 = vld [vmem:[#allocation2 + $0x328] sm:$0xff]  ;;  %v411_v25 = vld [vmem:[#allocation2 + $0xb90] sm:$0xff]  ;;  %v324_v26 = vld [vmem:[#allocation2 + $0x8d8] sm:$0xff] }
  0x89   :  { %v627_v5 = vadd.f32 %v626_v57, %v513_v51  ;;  %v683_v42 = vadd.f32 %v682_v30, %v450_v24  ;;  %v843_v51 = vadd.f32 %v842_v39, %v197_v33  ;;  %v213_v57 = vld [vmem:[#allocation2 + $0x560] sm:$0xff]  ;;  %v738_v61 = vadd.f32 %v737_v49, %v379_v43  ;;  %v150_v16 = vld [vmem:[#allocation2 + $0x368] sm:$0xff]  ;;  %v419_v37 = vld [vmem:[#allocation2 + $0xbd0] sm:$0xff] }
  0x8a   :  { %v897_v58 = vadd.f32 %v896_v46, %v118_v40  ;;  %v791_v62 = vadd.f32 %v790_v50, %v292_v44  ;;  %v237_v27 = vld [vmem:[#allocation2 + $0x620] sm:$0xff]  ;;  %v498_v30 = vld [vmem:[#allocation2 + $0xe48] sm:$0xff]  ;;  %v332_v38 = vld [vmem:[#allocation2 + $0x918] sm:$0xff] }
  0x8b   :  { %v628_v17 = vadd.f32 %v627_v5, %v521_v63  ;;  %v684_v54 = vadd.f32 %v683_v42, %v458_v36  ;;  %v844_v63 = vadd.f32 %v843_v51, %v205_v45  ;;  %v221_v5 = vld [vmem:[#allocation2 + $0x5a0] sm:$0xff]  ;;  %v739_v9 = vadd.f32 %v738_v61, %v387_v55  ;;  %v158_v34 = vld [vmem:[#allocation2 + $0x3a8] sm:$0xff]  ;;  %v427_v49 = vld [vmem:[#allocation2 + $0xc10] sm:$0xff] }
  0x8c   :  { %v898_v6 = vadd.f32 %v897_v58, %v126_v52  ;;  %v792_v10 = vadd.f32 %v791_v62, %v300_v56  ;;  %v245_v39 = vld [vmem:[#allocation2 + $0x660] sm:$0xff]  ;;  %v506_v42 = vld [vmem:[#allocation2 + $0xe88] sm:$0xff]  ;;  %v340_v50 = vld [vmem:[#allocation2 + $0x958] sm:$0xff] }
  0x8d   :  { %v629_v29 = vadd.f32 %v628_v17, %v529_v11  ;;  %v685_v2 = vadd.f32 %v684_v54, %v466_v48  ;;  %v845_v11 = vadd.f32 %v844_v63, %v213_v57  ;;  %v740_v18 = vadd.f32 %v739_v9, %v395_v3  ;;  %v166_v46 = vld [vmem:[#allocation2 + $0x3e8] sm:$0xff]  ;;  %v253_v51 = vld [vmem:[#allocation2 + $0x6a0] sm:$0xff]  ;;  %v435_v61 = vld [vmem:[#allocation2 + $0xc50] sm:$0xff] }
  0x8e   :  { %v899_v17 = vadd.f32 %v898_v6, %v134_v0  ;;  %v793_v19 = vadd.f32 %v792_v10, %v308_v4  ;;  %v514_v54 = vld [vmem:[#allocation2 + $0xec8] sm:$0xff]  ;;  %v348_v62 = vld [vmem:[#allocation2 + $0x998] sm:$0xff]  ;;  %v261_v63 = vld [vmem:[#allocation2 + $0x6e0] sm:$0xff] }
  0x8f   :  { %v630_v41 = vadd.f32 %v629_v29, %v537_v23  ;;  %v686_v13 = vadd.f32 %v685_v2, %v474_v59  ;;  %v846_v20 = vadd.f32 %v845_v11, %v221_v5  ;;  %v63_v23 = vld [vmem:[#allocation2 + $0xb0] sm:$0xff]  ;;  %v953_v29 = vadd.f32 %v55_v22, %v47_v21  ;;  %v174_v58 = vld [vmem:[#allocation2 + $0x428] sm:$0xff]  ;;  %v356_v10 = vld [vmem:[#allocation2 + $0x9d8] sm:$0xff] }
  0x90   :  { %v900_v28 = vadd.f32 %v899_v17, %v142_v12  ;;  %v741_v31 = vadd.f32 %v740_v18, %v403_v8  ;;  %v794_v32 = vadd.f32 %v793_v19, %v316_v14  ;;  %v87_v59 = vld [vmem:[#allocation2 + $0x170] sm:$0xff]  ;;  %v522_v2 = vld [vmem:[#allocation2 + $0xf08] sm:$0xff]  ;;  %v269_v11 = vld [vmem:[#allocation2 + $0x720] sm:$0xff] }
  0x91   :  { %v631_v53 = vadd.f32 %v630_v41, %v545_v35  ;;  %v687_v24 = vadd.f32 %v686_v13, %v482_v60  ;;  %v847_v33 = vadd.f32 %v846_v20, %v229_v15  ;;  %v71_v35 = vld [vmem:[#allocation2 + $0xf0] sm:$0xff]  ;;  %v954_v41 = vadd.f32 %v953_v29, %v63_v23  ;;  %v182_v6 = vld [vmem:[#allocation2 + $0x468] sm:$0xff]  ;;  %v364_v22 = vld [vmem:[#allocation2 + $0xa18] sm:$0xff] }
  0x92   :  { %v901_v40 = vadd.f32 %v900_v28, %v150_v16  ;;  %v742_v43 = vadd.f32 %v741_v31, %v411_v25  ;;  %v795_v44 = vadd.f32 %v794_v32, %v324_v26  ;;  %v443_v9 = vld [vmem:[#allocation2 + $0xc90] sm:$0xff]  ;;  %v530_v14 = vld [vmem:[#allocation2 + $0xf48] sm:$0xff]  ;;  %v277_v23 = vld [vmem:[#allocation2 + $0x760] sm:$0xff] }
  0x93   :  { %v632_v1 = vadd.f32 %v631_v53, %v553_v47  ;;  %v688_v36 = vadd.f32 %v687_v24, %v490_v7  ;;  %v848_v45 = vadd.f32 %v847_v33, %v237_v27  ;;  %v79_v47 = vld [vmem:[#allocation2 + $0x130] sm:$0xff]  ;;  %v955_v53 = vadd.f32 %v954_v41, %v71_v35  ;;  %v190_v18 = vld [vmem:[#allocation2 + $0x4a8] sm:$0xff]  ;;  %v285_v35 = vld [vmem:[#allocation2 + $0x7a0] sm:$0xff] }
  0x94   :  { %v902_v52 = vadd.f32 %v901_v40, %v158_v34  ;;  %v743_v55 = vadd.f32 %v742_v43, %v419_v37  ;;  %v796_v56 = vadd.f32 %v795_v44, %v332_v38  ;;  %v95_v7 = vld [vmem:[#allocation2 + $0x1b0] sm:$0xff]  ;;  %v538_v26 = vld [vmem:[#allocation2 + $0xf88] sm:$0xff]  ;;  %v372_v34 = vld [vmem:[#allocation2 + $0xa58] sm:$0xff] }
  0x95   :  { %1089 = vst [vmem:[#allocation5] sm:$0xff] %v632_v1  ;;  %v689_v48 = vadd.f32 %v688_v36, %v498_v30  ;;  %v849_v57 = vadd.f32 %v848_v45, %v245_v39  ;;  %v956_v1 = vadd.f32 %v955_v53, %v79_v47  ;;  %v103_v19 = vld [vmem:[#allocation2 + $0x1f0] sm:$0xff]  ;;  %v198_v30 = vld [vmem:[#allocation2 + $0x4e8] sm:$0xff]  ;;  %v293_v47 = vld [vmem:[#allocation2 + $0x7e0] sm:$0xff] }
  0x96   :  { %v903_v0 = vadd.f32 %v902_v52, %v166_v46  ;;  %v744_v3 = vadd.f32 %v743_v55, %v427_v49  ;;  %v797_v4 = vadd.f32 %v796_v56, %v340_v50  ;;  %v451_v21 = vld [vmem:[#allocation2 + $0xcd0] sm:$0xff]  ;;  %v546_v38 = vld [vmem:[#allocation2 + $0xfc8] sm:$0xff]  ;;  %v380_v46 = vld [vmem:[#allocation2 + $0xa98] sm:$0xff] }
  0x97   :  { %v690_v60 = vadd.f32 %v689_v48, %v506_v42  ;;  %v850_v5 = vadd.f32 %v849_v57, %v253_v51  ;;  %v957_v13 = vadd.f32 %v956_v1, %v87_v59  ;;  %v111_v31 = vld [vmem:[#allocation2 + $0x230] sm:$0xff]  ;;  %v206_v42 = vld [vmem:[#allocation2 + $0x528] sm:$0xff]  ;;  %v301_v59 = vld [vmem:[#allocation2 + $0x820] sm:$0xff] }
  0x98   :  { %v904_v12 = vadd.f32 %v903_v0, %v174_v58  ;;  %v745_v15 = vadd.f32 %v744_v3, %v435_v61  ;;  %v798_v16 = vadd.f32 %v797_v4, %v348_v62  ;;  %v459_v33 = vld [vmem:[#allocation2 + $0xd10] sm:$0xff]  ;;  %v554_v50 = vld [vmem:[#allocation2 + $0x1008] sm:$0xff]  ;;  %v388_v58 = vld [vmem:[#allocation2 + $0xad8] sm:$0xff] }
  0x99   :  { %v691_v8 = vadd.f32 %v690_v60, %v514_v54  ;;  %v851_v17 = vadd.f32 %v850_v5, %v261_v63  ;;  %v958_v25 = vadd.f32 %v957_v13, %v95_v7  ;;  %v119_v43 = vld [vmem:[#allocation2 + $0x270] sm:$0xff]  ;;  %v214_v54 = vld [vmem:[#allocation2 + $0x568] sm:$0xff]  ;;  %v309_v7 = vld [vmem:[#allocation2 + $0x860] sm:$0xff] }
  0x9a   :  { %v905_v24 = vadd.f32 %v904_v12, %v182_v6  ;;  %v746_v27 = vadd.f32 %v745_v15, %v443_v9  ;;  %v799_v28 = vadd.f32 %v798_v16, %v356_v10  ;;  %v467_v45 = vld [vmem:[#allocation2 + $0xd50] sm:$0xff]  ;;  %v396_v6 = vld [vmem:[#allocation2 + $0xb18] sm:$0xff]  ;;  %v317_v16 = vld [vmem:[#allocation2 + $0x8a0] sm:$0xff] }
  0x9b   :  { %v692_v20 = vadd.f32 %v691_v8, %v522_v2  ;;  %v852_v29 = vadd.f32 %v851_v17, %v269_v11  ;;  %v959_v37 = vadd.f32 %v958_v25, %v103_v19  ;;  %v127_v55 = vld [vmem:[#allocation2 + $0x2b0] sm:$0xff]  ;;  %v222_v2 = vld [vmem:[#allocation2 + $0x5a8] sm:$0xff]  ;;  %v404_v11 = vld [vmem:[#allocation2 + $0xb58] sm:$0xff] }
  0x9c   :  { %v906_v36 = vadd.f32 %v905_v24, %v190_v18  ;;  %v747_v39 = vadd.f32 %v746_v27, %v451_v21  ;;  %v800_v40 = vadd.f32 %v799_v28, %v364_v22  ;;  %v475_v57 = vld [vmem:[#allocation2 + $0xd90] sm:$0xff]  ;;  %v238_v17 = vld [vmem:[#allocation2 + $0x628] sm:$0xff]  ;;  %v56_v25 = vld [vmem:[#allocation2 + $0x78] sm:$0xff] }
  0x9d   :  { %v693_v32 = vadd.f32 %v692_v20, %v530_v14  ;;  %v853_v41 = vadd.f32 %v852_v29, %v277_v23  ;;  %v960_v49 = vadd.f32 %v959_v37, %v111_v31  ;;  %v483_v62 = vld [vmem:[#allocation2 + $0xdd0] sm:$0xff]  ;;  %v230_v14 = vld [vmem:[#allocation2 + $0x5e8] sm:$0xff]  ;;  %v48_v20 = vld [vmem:[#allocation2 + $0x38] sm:$0xff] }
  0x9e   :  { %v907_v48 = vadd.f32 %v906_v36, %v198_v30  ;;  %v748_v51 = vadd.f32 %v747_v39, %v459_v33  ;;  %v801_v52 = vadd.f32 %v800_v40, %v372_v34  ;;  %v135_v3 = vld [vmem:[#allocation2 + $0x2f0] sm:$0xff]  ;;  %v412_v28 = vld [vmem:[#allocation2 + $0xb98] sm:$0xff]  ;;  %v325_v29 = vld [vmem:[#allocation2 + $0x8e0] sm:$0xff] }
  0x9f   :  { %v694_v44 = vadd.f32 %v693_v32, %v538_v26  ;;  %v854_v53 = vadd.f32 %v853_v41, %v285_v35  ;;  %v961_v61 = vadd.f32 %v960_v49, %v119_v43  ;;  %v491_v5 = vld [vmem:[#allocation2 + $0xe10] sm:$0xff]  ;;  %v64_v26 = vld [vmem:[#allocation2 + $0xb8] sm:$0xff]  ;;  %v1017_v32 = vadd.f32 %v56_v25, %v48_v20  ;;  %v246_v36 = vld [vmem:[#allocation2 + $0x668] sm:$0xff] }
  0xa0   :  { %v908_v60 = vadd.f32 %v907_v48, %v206_v42  ;;  %v749_v63 = vadd.f32 %v748_v51, %v467_v45  ;;  %v802_v0 = vadd.f32 %v801_v52, %v380_v46  ;;  %v143_v15 = vld [vmem:[#allocation2 + $0x330] sm:$0xff]  ;;  %v420_v40 = vld [vmem:[#allocation2 + $0xbd8] sm:$0xff]  ;;  %v333_v41 = vld [vmem:[#allocation2 + $0x920] sm:$0xff] }
  0xa1   :  { %v695_v56 = vadd.f32 %v694_v44, %v546_v38  ;;  %v855_v1 = vadd.f32 %v854_v53, %v293_v47  ;;  %v962_v9 = vadd.f32 %v961_v61, %v127_v55  ;;  %v151_v24 = vld [vmem:[#allocation2 + $0x370] sm:$0xff]  ;;  %v72_v38 = vld [vmem:[#allocation2 + $0xf8] sm:$0xff]  ;;  %v1018_v44 = vadd.f32 %v1017_v32, %v64_v26  ;;  %v254_v48 = vld [vmem:[#allocation2 + $0x6a8] sm:$0xff] }
  0xa2   :  { %v909_v8 = vadd.f32 %v908_v60, %v214_v54  ;;  %v750_v10 = vadd.f32 %v749_v63, %v475_v57  ;;  %v803_v12 = vadd.f32 %v802_v0, %v388_v58  ;;  %v499_v27 = vld [vmem:[#allocation2 + $0xe50] sm:$0xff]  ;;  %v428_v52 = vld [vmem:[#allocation2 + $0xc18] sm:$0xff]  ;;  %v341_v53 = vld [vmem:[#allocation2 + $0x960] sm:$0xff] }
  0xa3   :  { %v696_v4 = vadd.f32 %v695_v56, %v554_v50  ;;  %v856_v13 = vadd.f32 %v855_v1, %v301_v59  ;;  %v963_v19 = vadd.f32 %v962_v9, %v135_v3  ;;  %v159_v37 = vld [vmem:[#allocation2 + $0x3b0] sm:$0xff]  ;;  %v80_v50 = vld [vmem:[#allocation2 + $0x138] sm:$0xff]  ;;  %v1019_v56 = vadd.f32 %v1018_v44, %v72_v38  ;;  %v262_v60 = vld [vmem:[#allocation2 + $0x6e8] sm:$0xff] }
  0xa4   :  { %v910_v18 = vadd.f32 %v909_v8, %v222_v2  ;;  %v751_v21 = vadd.f32 %v750_v10, %v483_v62  ;;  %v804_v22 = vadd.f32 %v803_v12, %v396_v6  ;;  %v507_v39 = vld [vmem:[#allocation2 + $0xe90] sm:$0xff]  ;;  %v88_v62 = vld [vmem:[#allocation2 + $0x178] sm:$0xff]  ;;  %v349_v1 = vld [vmem:[#allocation2 + $0x9a0] sm:$0xff] }
  0xa5   :  { %v857_v23 = vadd.f32 %v856_v13, %v309_v7  ;;  %1090 = vst [vmem:[#allocation5 + $0x8] sm:$0xff] %v696_v4  ;;  %v964_v31 = vadd.f32 %v963_v19, %v143_v15  ;;  %v167_v49 = vld [vmem:[#allocation2 + $0x3f0] sm:$0xff]  ;;  %v436_v0 = vld [vmem:[#allocation2 + $0xc58] sm:$0xff]  ;;  %v1020_v4 = vadd.f32 %v1019_v56, %v80_v50  ;;  %v270_v8 = vld [vmem:[#allocation2 + $0x728] sm:$0xff] }
  0xa6   :  { %v911_v30 = vadd.f32 %v910_v18, %v230_v14  ;;  %v752_v33 = vadd.f32 %v751_v21, %v491_v5  ;;  %v805_v34 = vadd.f32 %v804_v22, %v404_v11  ;;  %v515_v51 = vld [vmem:[#allocation2 + $0xed0] sm:$0xff]  ;;  %v96_v10 = vld [vmem:[#allocation2 + $0x1b8] sm:$0xff]  ;;  %v357_v13 = vld [vmem:[#allocation2 + $0x9e0] sm:$0xff] }
  0xa7   :  { %v858_v35 = vadd.f32 %v857_v23, %v317_v16  ;;  %v965_v43 = vadd.f32 %v964_v31, %v151_v24  ;;  %v175_v61 = vld [vmem:[#allocation2 + $0x430] sm:$0xff]  ;;  %v444_v12 = vld [vmem:[#allocation2 + $0xc98] sm:$0xff]  ;;  %v1021_v16 = vadd.f32 %v1020_v4, %v88_v62  ;;  %v278_v20 = vld [vmem:[#allocation2 + $0x768] sm:$0xff] }
  0xa8   :  { %v912_v42 = vadd.f32 %v911_v30, %v238_v17  ;;  %v753_v45 = vadd.f32 %v752_v33, %v499_v27  ;;  %v806_v46 = vadd.f32 %v805_v34, %v412_v28  ;;  %v523_v63 = vld [vmem:[#allocation2 + $0xf10] sm:$0xff]  ;;  %v104_v22 = vld [vmem:[#allocation2 + $0x1f8] sm:$0xff]  ;;  %v365_v25 = vld [vmem:[#allocation2 + $0xa20] sm:$0xff] }
  0xa9   :  { %v859_v47 = vadd.f32 %v858_v35, %v325_v29  ;;  %v966_v55 = vadd.f32 %v965_v43, %v159_v37  ;;  %v183_v9 = vld [vmem:[#allocation2 + $0x470] sm:$0xff]  ;;  %v452_v24 = vld [vmem:[#allocation2 + $0xcd8] sm:$0xff]  ;;  %v1022_v28 = vadd.f32 %v1021_v16, %v96_v10  ;;  %v286_v32 = vld [vmem:[#allocation2 + $0x7a8] sm:$0xff] }
  0xaa   :  { %v913_v54 = vadd.f32 %v912_v42, %v246_v36  ;;  %v754_v57 = vadd.f32 %v753_v45, %v507_v39  ;;  %v807_v58 = vadd.f32 %v806_v46, %v420_v40  ;;  %v531_v11 = vld [vmem:[#allocation2 + $0xf50] sm:$0xff]  ;;  %v112_v34 = vld [vmem:[#allocation2 + $0x238] sm:$0xff]  ;;  %v373_v37 = vld [vmem:[#allocation2 + $0xa60] sm:$0xff] }
  0xab   :  { %v860_v59 = vadd.f32 %v859_v47, %v333_v41  ;;  %v967_v3 = vadd.f32 %v966_v55, %v167_v49  ;;  %v191_v21 = vld [vmem:[#allocation2 + $0x4b0] sm:$0xff]  ;;  %v460_v36 = vld [vmem:[#allocation2 + $0xd18] sm:$0xff]  ;;  %v1023_v40 = vadd.f32 %v1022_v28, %v104_v22  ;;  %v294_v44 = vld [vmem:[#allocation2 + $0x7e8] sm:$0xff] }
  0xac   :  { %v914_v2 = vadd.f32 %v913_v54, %v254_v48  ;;  %v755_v5 = vadd.f32 %v754_v57, %v515_v51  ;;  %v808_v6 = vadd.f32 %v807_v58, %v428_v52  ;;  %v539_v23 = vld [vmem:[#allocation2 + $0xf90] sm:$0xff]  ;;  %v120_v46 = vld [vmem:[#allocation2 + $0x278] sm:$0xff]  ;;  %v381_v49 = vld [vmem:[#allocation2 + $0xaa0] sm:$0xff] }
  0xad   :  { %v861_v7 = vadd.f32 %v860_v59, %v341_v53  ;;  %v968_v15 = vadd.f32 %v967_v3, %v175_v61  ;;  %v199_v33 = vld [vmem:[#allocation2 + $0x4f0] sm:$0xff]  ;;  %v468_v48 = vld [vmem:[#allocation2 + $0xd58] sm:$0xff]  ;;  %v1024_v52 = vadd.f32 %v1023_v40, %v112_v34  ;;  %v302_v56 = vld [vmem:[#allocation2 + $0x828] sm:$0xff] }
  0xae   :  { %v915_v14 = vadd.f32 %v914_v2, %v262_v60  ;;  %v756_v17 = vadd.f32 %v755_v5, %v523_v63  ;;  %v809_v18 = vadd.f32 %v808_v6, %v436_v0  ;;  %v547_v35 = vld [vmem:[#allocation2 + $0xfd0] sm:$0xff]  ;;  %v128_v58 = vld [vmem:[#allocation2 + $0x2b8] sm:$0xff]  ;;  %v389_v60 = vld [vmem:[#allocation2 + $0xae0] sm:$0xff] }
  0xaf   :  { %v862_v19 = vadd.f32 %v861_v7, %v349_v1  ;;  %v969_v27 = vadd.f32 %v968_v15, %v183_v9  ;;  %v207_v45 = vld [vmem:[#allocation2 + $0x530] sm:$0xff]  ;;  %v476_v59 = vld [vmem:[#allocation2 + $0xd98] sm:$0xff]  ;;  %v1025_v63 = vadd.f32 %v1024_v52, %v120_v46  ;;  %v310_v3 = vld [vmem:[#allocation2 + $0x868] sm:$0xff] }
  0xb0   :  { %v916_v26 = vadd.f32 %v915_v14, %v270_v8  ;;  %v757_v29 = vadd.f32 %v756_v17, %v531_v11  ;;  %v810_v30 = vadd.f32 %v809_v18, %v444_v12  ;;  %v555_v47 = vld [vmem:[#allocation2 + $0x1010] sm:$0xff]  ;;  %v136_v5 = vld [vmem:[#allocation2 + $0x2f8] sm:$0xff]  ;;  %v397_v7 = vld [vmem:[#allocation2 + $0xb20] sm:$0xff] }
  0xb1   :  { %v863_v31 = vadd.f32 %v862_v19, %v357_v13  ;;  %v970_v39 = vadd.f32 %v969_v27, %v191_v21  ;;  %v215_v57 = vld [vmem:[#allocation2 + $0x570] sm:$0xff]  ;;  %v484_v6 = vld [vmem:[#allocation2 + $0xdd8] sm:$0xff]  ;;  %v1026_v10 = vadd.f32 %v1025_v63, %v128_v58  ;;  %v318_v13 = vld [vmem:[#allocation2 + $0x8a8] sm:$0xff] }
  0xb2   :  { %v917_v38 = vadd.f32 %v916_v26, %v278_v20  ;;  %v758_v41 = vadd.f32 %v757_v29, %v539_v23  ;;  %v811_v42 = vadd.f32 %v810_v30, %v452_v24  ;;  %v223_v4 = vld [vmem:[#allocation2 + $0x5b0] sm:$0xff]  ;;  %v144_v15 = vld [vmem:[#allocation2 + $0x338] sm:$0xff]  ;;  %v405_v17 = vld [vmem:[#allocation2 + $0xb60] sm:$0xff] }
  0xb3   :  { %v864_v43 = vadd.f32 %v863_v31, %v365_v25  ;;  %v971_v51 = vadd.f32 %v970_v39, %v199_v33  ;;  %v231_v14 = vld [vmem:[#allocation2 + $0x5f0] sm:$0xff]  ;;  %v492_v16 = vld [vmem:[#allocation2 + $0xe18] sm:$0xff]  ;;  %v1027_v20 = vadd.f32 %v1026_v10, %v136_v5  ;;  %v326_v23 = vld [vmem:[#allocation2 + $0x8e8] sm:$0xff] }
  0xb4   :  { %v918_v50 = vadd.f32 %v917_v38, %v286_v32  ;;  %v759_v53 = vadd.f32 %v758_v41, %v547_v35  ;;  %v812_v54 = vadd.f32 %v811_v42, %v460_v36  ;;  %v239_v24 = vld [vmem:[#allocation2 + $0x630] sm:$0xff]  ;;  %v152_v25 = vld [vmem:[#allocation2 + $0x378] sm:$0xff]  ;;  %v413_v27 = vld [vmem:[#allocation2 + $0xba0] sm:$0xff] }
  0xb5   :  { %v865_v55 = vadd.f32 %v864_v43, %v373_v37  ;;  %v972_v62 = vadd.f32 %v971_v51, %v207_v45  ;;  %v500_v26 = vld [vmem:[#allocation2 + $0xe58] sm:$0xff]  ;;  %v1028_v30 = vadd.f32 %v1027_v20, %v144_v15  ;;  %v334_v33 = vld [vmem:[#allocation2 + $0x928] sm:$0xff]  ;;  %v247_v34 = vld [vmem:[#allocation2 + $0x670] sm:$0xff] }
  0xb6   :  { %v919_v61 = vadd.f32 %v918_v50, %v294_v44  ;;  %v760_v0 = vadd.f32 %v759_v53, %v555_v47  ;;  %v813_v1 = vadd.f32 %v812_v54, %v468_v48  ;;  %v160_v35 = vld [vmem:[#allocation2 + $0x3b8] sm:$0xff]  ;;  %v421_v37 = vld [vmem:[#allocation2 + $0xbe0] sm:$0xff]  ;;  %v342_v43 = vld [vmem:[#allocation2 + $0x968] sm:$0xff] }
  0xb7   :  { %v866_v2 = vadd.f32 %v865_v55, %v381_v49  ;;  %v973_v9 = vadd.f32 %v972_v62, %v215_v57  ;;  %v508_v36 = vld [vmem:[#allocation2 + $0xe98] sm:$0xff]  ;;  %v1029_v40 = vadd.f32 %v1028_v30, %v152_v25  ;;  %v255_v44 = vld [vmem:[#allocation2 + $0x6b0] sm:$0xff]  ;;  %v429_v47 = vld [vmem:[#allocation2 + $0xc20] sm:$0xff] }
  0xb8   :  { %v920_v8 = vadd.f32 %v919_v61, %v302_v56  ;;  %v814_v11 = vadd.f32 %v813_v1, %v476_v59  ;;  %1091 = vst [vmem:[#allocation5 + $0x10] sm:$0xff] %v760_v0  ;;  %v168_v45 = vld [vmem:[#allocation2 + $0x3f8] sm:$0xff]  ;;  %v350_v53 = vld [vmem:[#allocation2 + $0x9a8] sm:$0xff]  ;;  %v263_v54 = vld [vmem:[#allocation2 + $0x6f0] sm:$0xff] }
  0xb9   :  { %v867_v12 = vadd.f32 %v866_v2, %v389_v60  ;;  %v974_v19 = vadd.f32 %v973_v9, %v223_v4  ;;  %v516_v46 = vld [vmem:[#allocation2 + $0xed8] sm:$0xff]  ;;  %v1030_v50 = vadd.f32 %v1029_v40, %v160_v35  ;;  %v437_v57 = vld [vmem:[#allocation2 + $0xc60] sm:$0xff]  ;;  %v358_v63 = vld [vmem:[#allocation2 + $0x9e8] sm:$0xff] }
  0xba   :  { %v921_v18 = vadd.f32 %v920_v8, %v310_v3  ;;  %v815_v21 = vadd.f32 %v814_v11, %v484_v6  ;;  %v176_v55 = vld [vmem:[#allocation2 + $0x438] sm:$0xff]  ;;  %v271_v0 = vld [vmem:[#allocation2 + $0x730] sm:$0xff]  ;;  %v445_v3 = vld [vmem:[#allocation2 + $0xca0] sm:$0xff] }
  0xbb   :  { %v868_v22 = vadd.f32 %v867_v12, %v397_v7  ;;  %v975_v29 = vadd.f32 %v974_v19, %v231_v14  ;;  %v524_v56 = vld [vmem:[#allocation2 + $0xf18] sm:$0xff]  ;;  %v1031_v60 = vadd.f32 %v1030_v50, %v168_v45  ;;  %v366_v9 = vld [vmem:[#allocation2 + $0xa28] sm:$0xff]  ;;  %v279_v10 = vld [vmem:[#allocation2 + $0x770] sm:$0xff] }
  0xbc   :  { %v922_v28 = vadd.f32 %v921_v18, %v318_v13  ;;  %v816_v31 = vadd.f32 %v815_v21, %v492_v16  ;;  %v184_v1 = vld [vmem:[#allocation2 + $0x478] sm:$0xff]  ;;  %v453_v13 = vld [vmem:[#allocation2 + $0xce0] sm:$0xff]  ;;  %v374_v19 = vld [vmem:[#allocation2 + $0xa68] sm:$0xff] }
  0xbd   :  { %v869_v32 = vadd.f32 %v868_v22, %v405_v17  ;;  %v976_v39 = vadd.f32 %v975_v29, %v239_v24  ;;  %v532_v2 = vld [vmem:[#allocation2 + $0xf58] sm:$0xff]  ;;  %v1032_v6 = vadd.f32 %v1031_v60, %v176_v55  ;;  %v287_v20 = vld [vmem:[#allocation2 + $0x7b0] sm:$0xff]  ;;  %v382_v29 = vld [vmem:[#allocation2 + $0xaa8] sm:$0xff] }
  0xbe   :  { %v923_v38 = vadd.f32 %v922_v28, %v326_v23  ;;  %v817_v41 = vadd.f32 %v816_v31, %v500_v26  ;;  %v192_v11 = vld [vmem:[#allocation2 + $0x4b8] sm:$0xff]  ;;  %v461_v23 = vld [vmem:[#allocation2 + $0xd20] sm:$0xff]  ;;  %v295_v30 = vld [vmem:[#allocation2 + $0x7f0] sm:$0xff] }
  0xbf   :  { %v870_v42 = vadd.f32 %v869_v32, %v413_v27  ;;  %v977_v49 = vadd.f32 %v976_v39, %v247_v34  ;;  %v540_v12 = vld [vmem:[#allocation2 + $0xf98] sm:$0xff]  ;;  %v1033_v16 = vadd.f32 %v1032_v6, %v184_v1  ;;  %v390_v39 = vld [vmem:[#allocation2 + $0xae8] sm:$0xff]  ;;  %v303_v40 = vld [vmem:[#allocation2 + $0x830] sm:$0xff] }
  0xc0   :  { %v924_v48 = vadd.f32 %v923_v38, %v334_v33  ;;  %v818_v51 = vadd.f32 %v817_v41, %v508_v36  ;;  %v200_v21 = vld [vmem:[#allocation2 + $0x4f8] sm:$0xff]  ;;  %v469_v33 = vld [vmem:[#allocation2 + $0xd60] sm:$0xff]  ;;  %v327_v1 = vld [vmem:[#allocation2 + $0x8f0] sm:$0xff] }
  0xc1   :  { %v871_v52 = vadd.f32 %v870_v42, %v421_v37  ;;  %v978_v59 = vadd.f32 %v977_v49, %v255_v44  ;;  %v548_v22 = vld [vmem:[#allocation2 + $0xfd8] sm:$0xff]  ;;  %v1034_v26 = vadd.f32 %v1033_v16, %v192_v11  ;;  %v477_v42 = vld [vmem:[#allocation2 + $0xda0] sm:$0xff]  ;;  %v311_v49 = vld [vmem:[#allocation2 + $0x870] sm:$0xff] }
  0xc2   :  { %v925_v58 = vadd.f32 %v924_v48, %v342_v43  ;;  %v819_v61 = vadd.f32 %v818_v51, %v516_v46  ;;  %v208_v31 = vld [vmem:[#allocation2 + $0x538] sm:$0xff]  ;;  %v398_v48 = vld [vmem:[#allocation2 + $0xb28] sm:$0xff]  ;;  %v485_v51 = vld [vmem:[#allocation2 + $0xde0] sm:$0xff] }
  0xc3   :  { %v872_v62 = vadd.f32 %v871_v52, %v429_v47  ;;  %v979_v5 = vadd.f32 %v978_v59, %v263_v54  ;;  %v556_v32 = vld [vmem:[#allocation2 + $0x1018] sm:$0xff]  ;;  %v1035_v36 = vadd.f32 %v1034_v26, %v200_v21  ;;  %v493_v59 = vld [vmem:[#allocation2 + $0xe20] sm:$0xff]  ;;  %v430_v16 = vld [vmem:[#allocation2 + $0xc28] sm:$0xff] }
  0xc4   :  { %v926_v4 = vadd.f32 %v925_v58, %v350_v53  ;;  %v820_v7 = vadd.f32 %v819_v61, %v524_v56  ;;  %v216_v41 = vld [vmem:[#allocation2 + $0x578] sm:$0xff]  ;;  %v406_v56 = vld [vmem:[#allocation2 + $0xb68] sm:$0xff]  ;;  %v509_v11 = vld [vmem:[#allocation2 + $0xea0] sm:$0xff] }
  0xc5   :  { %v873_v8 = vadd.f32 %v872_v62, %v437_v57  ;;  %v980_v15 = vadd.f32 %v979_v5, %v271_v0  ;;  %v1036_v45 = vadd.f32 %v1035_v36, %v208_v31  ;;  %v224_v50 = vld [vmem:[#allocation2 + $0x5b8] sm:$0xff]  ;;  %v319_v57 = vld [vmem:[#allocation2 + $0x8b0] sm:$0xff]  ;;  %v414_v0 = vld [vmem:[#allocation2 + $0xba8] sm:$0xff] }
  0xc6   :  { %v927_v14 = vadd.f32 %v926_v4, %v358_v63  ;;  %v821_v17 = vadd.f32 %v820_v7, %v532_v2  ;;  %v232_v58 = vld [vmem:[#allocation2 + $0x5f8] sm:$0xff] }
  0xc7   :  { %v874_v18 = vadd.f32 %v873_v8, %v445_v3  ;;  %v981_v25 = vadd.f32 %v980_v15, %v279_v10  ;;  %v1037_v54 = vadd.f32 %v1036_v45, %v216_v41  ;;  %v240_v2 = vld [vmem:[#allocation2 + $0x638] sm:$0xff]  ;;  %v501_v3 = vld [vmem:[#allocation2 + $0xe60] sm:$0xff]  ;;  %v422_v8 = vld [vmem:[#allocation2 + $0xbe8] sm:$0xff] }
  0xc8   :  { %v928_v24 = vadd.f32 %v927_v14, %v366_v9  ;;  %v822_v27 = vadd.f32 %v821_v17, %v540_v12  ;;  %v335_v9 = vld [vmem:[#allocation2 + $0x930] sm:$0xff]  ;;  %v248_v10 = vld [vmem:[#allocation2 + $0x678] sm:$0xff] }
  0xc9   :  { %v875_v28 = vadd.f32 %v874_v18, %v453_v13  ;;  %v982_v35 = vadd.f32 %v981_v25, %v287_v20  ;;  %v1038_v62 = vadd.f32 %v1037_v54, %v224_v50  ;;  %v343_v17 = vld [vmem:[#allocation2 + $0x970] sm:$0xff]  ;;  %v256_v18 = vld [vmem:[#allocation2 + $0x6b8] sm:$0xff] }
  0xca   :  { %v929_v34 = vadd.f32 %v928_v24, %v374_v19  ;;  %v823_v37 = vadd.f32 %v822_v27, %v548_v22  ;;  %v517_v19 = vld [vmem:[#allocation2 + $0xee0] sm:$0xff]  ;;  %v438_v24 = vld [vmem:[#allocation2 + $0xc68] sm:$0xff]  ;;  %v351_v25 = vld [vmem:[#allocation2 + $0x9b0] sm:$0xff] }
  0xcb   :  { %v876_v38 = vadd.f32 %v875_v28, %v461_v23  ;;  %v983_v44 = vadd.f32 %v982_v35, %v295_v30  ;;  %v1039_v6 = vadd.f32 %v1038_v62, %v232_v58  ;;  %v264_v26 = vld [vmem:[#allocation2 + $0x6f8] sm:$0xff]  ;;  %v525_v27 = vld [vmem:[#allocation2 + $0xf20] sm:$0xff]  ;;  %v367_v41 = vld [vmem:[#allocation2 + $0xa30] sm:$0xff] }
  0xcc   :  { %v930_v43 = vadd.f32 %v929_v34, %v382_v29  ;;  %v824_v46 = vadd.f32 %v823_v37, %v556_v32  ;;  %v446_v32 = vld [vmem:[#allocation2 + $0xca8] sm:$0xff]  ;;  %v272_v34 = vld [vmem:[#allocation2 + $0x738] sm:$0xff]  ;;  %v533_v35 = vld [vmem:[#allocation2 + $0xf60] sm:$0xff] }
  0xcd   :  { %v877_v47 = vadd.f32 %v876_v38, %v469_v33  ;;  %v984_v53 = vadd.f32 %v983_v44, %v303_v40  ;;  %v1040_v14 = vadd.f32 %v1039_v6, %v240_v2  ;;  %v359_v33 = vld [vmem:[#allocation2 + $0x9f0] sm:$0xff]  ;;  %v454_v40 = vld [vmem:[#allocation2 + $0xce8] sm:$0xff]  ;;  %v288_v50 = vld [vmem:[#allocation2 + $0x7b8] sm:$0xff] }
  0xce   :  { %v931_v52 = vadd.f32 %v930_v43, %v390_v39  ;;  %1092 = vst [vmem:[#allocation5 + $0x18] sm:$0xff] %v824_v46  ;;  %v541_v43 = vld [vmem:[#allocation2 + $0xfa0] sm:$0xff]  ;;  %v296_v58 = vld [vmem:[#allocation2 + $0x7f8] sm:$0xff] }
  0xcf   :  { %v878_v55 = vadd.f32 %v877_v47, %v477_v42  ;;  %v985_v61 = vadd.f32 %v984_v53, %v311_v49  ;;  %v1041_v22 = vadd.f32 %v1040_v14, %v248_v10  ;;  %v280_v42 = vld [vmem:[#allocation2 + $0x778] sm:$0xff]  ;;  %v375_v49 = vld [vmem:[#allocation2 + $0xa70] sm:$0xff] }
  0xd0   :  { %v932_v60 = vadd.f32 %v931_v52, %v398_v48  ;;  %v462_v48 = vld [vmem:[#allocation2 + $0xd28] sm:$0xff]  ;;  %v304_v2 = vld [vmem:[#allocation2 + $0x838] sm:$0xff]  ;;  %v407_v14 = vld [vmem:[#allocation2 + $0xb70] sm:$0xff] }
  0xd1   :  { %v879_v63 = vadd.f32 %v878_v55, %v485_v51  ;;  %v986_v5 = vadd.f32 %v985_v61, %v319_v57  ;;  %v1042_v30 = vadd.f32 %v1041_v22, %v256_v18  ;;  %v549_v51 = vld [vmem:[#allocation2 + $0xfe0] sm:$0xff]  ;;  %v383_v57 = vld [vmem:[#allocation2 + $0xab0] sm:$0xff] }
  0xd2   :  { %v933_v4 = vadd.f32 %v932_v60, %v406_v56  ;;  %v470_v56 = vld [vmem:[#allocation2 + $0xd68] sm:$0xff] }
  0xd3   :  { %v880_v7 = vadd.f32 %v879_v63, %v493_v59  ;;  %v987_v13 = vadd.f32 %v986_v5, %v327_v1  ;;  %v1043_v38 = vadd.f32 %v1042_v30, %v264_v26  ;;  %v557_v59 = vld [vmem:[#allocation2 + $0x1020] sm:$0xff]  ;;  %v391_v1 = vld [vmem:[#allocation2 + $0xaf0] sm:$0xff] }
  0xd4   :  { %v934_v12 = vadd.f32 %v933_v4, %v414_v0  ;;  %v478_v0 = vld [vmem:[#allocation2 + $0xda8] sm:$0xff]  ;;  %v423_v26 = vld [vmem:[#allocation2 + $0xbf0] sm:$0xff] }
  0xd5   :  { %v881_v15 = vadd.f32 %v880_v7, %v501_v3  ;;  %v988_v21 = vadd.f32 %v987_v13, %v335_v9  ;;  %v1044_v46 = vadd.f32 %v1043_v38, %v272_v34  ;;  %v486_v7 = vld [vmem:[#allocation2 + $0xde8] sm:$0xff]  ;;  %v312_v9 = vld [vmem:[#allocation2 + $0x878] sm:$0xff]  ;;  %v439_v38 = vld [vmem:[#allocation2 + $0xc70] sm:$0xff] }
  0xd6   :  { %v935_v20 = vadd.f32 %v934_v12, %v422_v8  ;;  %v399_v8 = vld [vmem:[#allocation2 + $0xb30] sm:$0xff]  ;;  %v494_v13 = vld [vmem:[#allocation2 + $0xe28] sm:$0xff] }
  0xd7   :  { %v882_v23 = vadd.f32 %v881_v15, %v509_v11  ;;  %v989_v29 = vadd.f32 %v988_v21, %v343_v17  ;;  %v1045_v54 = vadd.f32 %v1044_v46, %v280_v42  ;;  %v320_v15 = vld [vmem:[#allocation2 + $0x8b8] sm:$0xff] }
  0xd8   :  { %v936_v28 = vadd.f32 %v935_v20, %v430_v16  ;;  %v415_v20 = vld [vmem:[#allocation2 + $0xbb0] sm:$0xff]  ;;  %v328_v21 = vld [vmem:[#allocation2 + $0x8f8] sm:$0xff] }
  0xd9   :  { %v883_v31 = vadd.f32 %v882_v23, %v517_v19  ;;  %v990_v37 = vadd.f32 %v989_v29, %v351_v25  ;;  %v1046_v62 = vadd.f32 %v1045_v54, %v288_v50  ;;  %v502_v19 = vld [vmem:[#allocation2 + $0xe68] sm:$0xff]  ;;  %v455_v50 = vld [vmem:[#allocation2 + $0xcf0] sm:$0xff] }
  0xda   :  { %v937_v36 = vadd.f32 %v936_v28, %v438_v24  ;;  %v510_v25 = vld [vmem:[#allocation2 + $0xea8] sm:$0xff] }
  0xdb   :  { %v884_v39 = vadd.f32 %v883_v31, %v525_v27  ;;  %v991_v45 = vadd.f32 %v990_v37, %v359_v33  ;;  %v1047_v5 = vadd.f32 %v1046_v62, %v296_v58  ;;  %v336_v27 = vld [vmem:[#allocation2 + $0x938] sm:$0xff]  ;;  %v518_v31 = vld [vmem:[#allocation2 + $0xee8] sm:$0xff]  ;;  %v471_v62 = vld [vmem:[#allocation2 + $0xd70] sm:$0xff] }
  0xdc   :  { %v938_v44 = vadd.f32 %v937_v36, %v446_v32  ;;  %v431_v32 = vld [vmem:[#allocation2 + $0xc30] sm:$0xff]  ;;  %v344_v33 = vld [vmem:[#allocation2 + $0x978] sm:$0xff]  ;;  %v526_v37 = vld [vmem:[#allocation2 + $0xf28] sm:$0xff] }
  0xdd   :  { %v885_v47 = vadd.f32 %v884_v39, %v533_v35  ;;  %v992_v53 = vadd.f32 %v991_v45, %v367_v41  ;;  %v1048_v12 = vadd.f32 %v1047_v5, %v304_v2  ;;  %v352_v39 = vld [vmem:[#allocation2 + $0x9b8] sm:$0xff] }
  0xde   :  { %v939_v52 = vadd.f32 %v938_v44, %v454_v40  ;;  %v447_v44 = vld [vmem:[#allocation2 + $0xcb0] sm:$0xff]  ;;  %v360_v45 = vld [vmem:[#allocation2 + $0x9f8] sm:$0xff] }
  0xdf   :  { %v886_v55 = vadd.f32 %v885_v47, %v541_v43  ;;  %v993_v61 = vadd.f32 %v992_v53, %v375_v49  ;;  %v1049_v18 = vadd.f32 %v1048_v12, %v312_v9  ;;  %v534_v43 = vld [vmem:[#allocation2 + $0xf68] sm:$0xff]  ;;  %v400_v9 = vld [vmem:[#allocation2 + $0xb38] sm:$0xff]  ;;  %v495_v12 = vld [vmem:[#allocation2 + $0xe30] sm:$0xff] }
  0xe0   :  { %v940_v60 = vadd.f32 %v939_v52, %v462_v48  ;;  %v542_v49 = vld [vmem:[#allocation2 + $0xfa8] sm:$0xff] }
  0xe1   :  { %v887_v63 = vadd.f32 %v886_v55, %v549_v51  ;;  %v994_v4 = vadd.f32 %v993_v61, %v383_v57  ;;  %v1050_v24 = vadd.f32 %v1049_v18, %v320_v15  ;;  %v368_v51 = vld [vmem:[#allocation2 + $0xa38] sm:$0xff]  ;;  %v550_v55 = vld [vmem:[#allocation2 + $0xfe8] sm:$0xff] }
  0xe2   :  { %v941_v3 = vadd.f32 %v940_v60, %v470_v56  ;;  %v463_v56 = vld [vmem:[#allocation2 + $0xd30] sm:$0xff]  ;;  %v376_v57 = vld [vmem:[#allocation2 + $0xa78] sm:$0xff]  ;;  %v558_v61 = vld [vmem:[#allocation2 + $0x1028] sm:$0xff] }
  0xe3   :  { %v888_v6 = vadd.f32 %v887_v63, %v557_v59  ;;  %v995_v11 = vadd.f32 %v994_v4, %v391_v1  ;;  %v1051_v30 = vadd.f32 %v1050_v24, %v328_v21  ;;  %v384_v63 = vld [vmem:[#allocation2 + $0xab8] sm:$0xff]  ;;  %v519_v24 = vld [vmem:[#allocation2 + $0xef0] sm:$0xff] }
  0xe4   :  { %v942_v10 = vadd.f32 %v941_v3, %v478_v0  ;;  %v479_v3 = vld [vmem:[#allocation2 + $0xdb0] sm:$0xff]  ;;  %v392_v4 = vld [vmem:[#allocation2 + $0xaf8] sm:$0xff] }
  0xe5   :  { %v996_v17 = vadd.f32 %v995_v11, %v399_v8  ;;  %1093 = vst [vmem:[#allocation5 + $0x20] sm:$0xff] %v888_v6  ;;  %v1052_v36 = vadd.f32 %v1051_v30, %v336_v27  ;;  %v487_v8 = vld [vmem:[#allocation2 + $0xdf0] sm:$0xff]  ;;  %v424_v21 = vld [vmem:[#allocation2 + $0xbf8] sm:$0xff] }
  0xe6   :  { %v943_v16 = vadd.f32 %v942_v10, %v486_v7 }
  0xe7   :  { %v997_v23 = vadd.f32 %v996_v17, %v407_v14  ;;  %v1053_v42 = vadd.f32 %v1052_v36, %v344_v33  ;;  %v416_v17 = vld [vmem:[#allocation2 + $0xbb8] sm:$0xff]  ;;  %v543_v36 = vld [vmem:[#allocation2 + $0xfb0] sm:$0xff] }
  0xe8   :  { %v944_v22 = vadd.f32 %v943_v16, %v494_v13  ;;  %v408_v13 = vld [vmem:[#allocation2 + $0xb78] sm:$0xff]  ;;  %v503_v16 = vld [vmem:[#allocation2 + $0xe70] sm:$0xff] }
  0xe9   :  { %v998_v29 = vadd.f32 %v997_v23, %v415_v20  ;;  %v1054_v48 = vadd.f32 %v1053_v42, %v352_v39  ;;  %v511_v20 = vld [vmem:[#allocation2 + $0xeb0] sm:$0xff]  ;;  %v448_v33 = vld [vmem:[#allocation2 + $0xcb8] sm:$0xff] }
  0xea   :  { %v945_v28 = vadd.f32 %v944_v22, %v502_v19 }
  0xeb   :  { %v999_v35 = vadd.f32 %v998_v29, %v423_v26  ;;  %v1055_v54 = vadd.f32 %v1054_v48, %v360_v45  ;;  %v440_v29 = vld [vmem:[#allocation2 + $0xc78] sm:$0xff] }
  0xec   :  { %v946_v34 = vadd.f32 %v945_v28, %v510_v25  ;;  %v432_v25 = vld [vmem:[#allocation2 + $0xc38] sm:$0xff]  ;;  %v527_v28 = vld [vmem:[#allocation2 + $0xf30] sm:$0xff] }
  0xed   :  { %v1000_v41 = vadd.f32 %v999_v35, %v431_v32  ;;  %v1056_v60 = vadd.f32 %v1055_v54, %v368_v51  ;;  %v535_v32 = vld [vmem:[#allocation2 + $0xf70] sm:$0xff]  ;;  %v472_v45 = vld [vmem:[#allocation2 + $0xd78] sm:$0xff] }
  0xee   :  { %v947_v40 = vadd.f32 %v946_v34, %v518_v31  ;;  %v480_v48 = vld [vmem:[#allocation2 + $0xdb8] sm:$0xff] }
  0xef   :  { %v1001_v47 = vadd.f32 %v1000_v41, %v439_v38  ;;  %v1057_v2 = vadd.f32 %v1056_v60, %v376_v57  ;;  %v464_v41 = vld [vmem:[#allocation2 + $0xd38] sm:$0xff] }
  0xf0   :  { %v948_v46 = vadd.f32 %v947_v40, %v526_v37  ;;  %v456_v37 = vld [vmem:[#allocation2 + $0xcf8] sm:$0xff]  ;;  %v551_v40 = vld [vmem:[#allocation2 + $0xff0] sm:$0xff] }
  0xf1   :  { %v1002_v53 = vadd.f32 %v1001_v47, %v447_v44  ;;  %v1058_v7 = vadd.f32 %v1057_v2, %v384_v63  ;;  %v559_v44 = vld [vmem:[#allocation2 + $0x1030] sm:$0xff]  ;;  %v488_v51 = vld [vmem:[#allocation2 + $0xdf8] sm:$0xff] }
  0xf2   :  { %v949_v52 = vadd.f32 %v948_v46, %v534_v43  ;;  %v512_v57 = vld [vmem:[#allocation2 + $0xeb8] sm:$0xff] }
  0xf3   :  { %v1003_v59 = vadd.f32 %v1002_v53, %v455_v50  ;;  %v1059_v11 = vadd.f32 %v1058_v7, %v392_v4  ;;  %v496_v53 = vld [vmem:[#allocation2 + $0xe38] sm:$0xff] }
  0xf4   :  { %v950_v58 = vadd.f32 %v949_v52, %v542_v49  ;;  %v536_v63 = vld [vmem:[#allocation2 + $0xf78] sm:$0xff] }
  0xf5   :  { %v1004_v1 = vadd.f32 %v1003_v59, %v463_v56  ;;  %v1060_v15 = vadd.f32 %v1059_v11, %v400_v9  ;;  %v520_v59 = vld [vmem:[#allocation2 + $0xef8] sm:$0xff] }
  0xf6   :  { %v951_v0 = vadd.f32 %v950_v58, %v550_v55  ;;  %v504_v55 = vld [vmem:[#allocation2 + $0xe78] sm:$0xff] }
  0xf7   :  { %v1005_v6 = vadd.f32 %v1004_v1, %v471_v62  ;;  %v1061_v19 = vadd.f32 %v1060_v15, %v408_v13  ;;  %v544_v1 = vld [vmem:[#allocation2 + $0xfb8] sm:$0xff] }
  0xf8   :  { %v952_v5 = vadd.f32 %v951_v0, %v558_v61  ;;  %v528_v61 = vld [vmem:[#allocation2 + $0xf38] sm:$0xff] }
  0xf9   :  { %v1006_v10 = vadd.f32 %v1005_v6, %v479_v3  ;;  %v1062_v23 = vadd.f32 %v1061_v19, %v416_v17  ;;  %v552_v3 = vld [vmem:[#allocation2 + $0xff8] sm:$0xff] }
  0xfa   :  { %1094 = vst [vmem:[#allocation5 + $0x28] sm:$0xff] %v952_v5  ;;  %v560_v5 = vld [vmem:[#allocation2 + $0x1038] sm:$0xff] }
  0xfb   :  { %v1007_v14 = vadd.f32 %v1006_v10, %v487_v8  ;;  %v1063_v27 = vadd.f32 %v1062_v23, %v424_v21 }
  0xfd   :  { %v1008_v18 = vadd.f32 %v1007_v14, %v495_v12  ;;  %v1064_v31 = vadd.f32 %v1063_v27, %v432_v25 }
  0xff   :  { %v1009_v22 = vadd.f32 %v1008_v18, %v503_v16  ;;  %v1065_v35 = vadd.f32 %v1064_v31, %v440_v29 }
 0x101   :  { %v1010_v26 = vadd.f32 %v1009_v22, %v511_v20  ;;  %v1066_v39 = vadd.f32 %v1065_v35, %v448_v33 }
 0x103   :  { %v1011_v30 = vadd.f32 %v1010_v26, %v519_v24  ;;  %v1067_v43 = vadd.f32 %v1066_v39, %v456_v37 }
 0x105   :  { %v1012_v34 = vadd.f32 %v1011_v30, %v527_v28  ;;  %v1068_v47 = vadd.f32 %v1067_v43, %v464_v41 }
 0x107   :  { %v1013_v38 = vadd.f32 %v1012_v34, %v535_v32  ;;  %v1069_v50 = vadd.f32 %v1068_v47, %v472_v45 }
 0x109   :  { %v1014_v42 = vadd.f32 %v1013_v38, %v543_v36  ;;  %v1070_v52 = vadd.f32 %v1069_v50, %v480_v48 }
 0x10b   :  { %v1015_v46 = vadd.f32 %v1014_v42, %v551_v40  ;;  %v1071_v54 = vadd.f32 %v1070_v52, %v488_v51 }
 0x10d   :  { %v1016_v49 = vadd.f32 %v1015_v46, %v559_v44  ;;  %v1072_v56 = vadd.f32 %v1071_v54, %v496_v53 }
 0x10f   :  { %1095 = vst [vmem:[#allocation5 + $0x30] sm:$0xff] %v1016_v49  ;;  %v1073_v58 = vadd.f32 %v1072_v56, %v504_v55 }
 0x111   :  { %v1074_v60 = vadd.f32 %v1073_v58, %v512_v57 }
 0x113   :  { %v1075_v62 = vadd.f32 %v1074_v60, %v520_v59 }
 0x115   :  { %v1076_v0 = vadd.f32 %v1075_v62, %v528_v61 }
 0x117   :  { %v1077_v2 = vadd.f32 %v1076_v0, %v536_v63 }
 0x119   :  { %v1078_v4 = vadd.f32 %v1077_v2, %v544_v1 }
 0x11b   :  { %v1079_v6 = vadd.f32 %v1078_v4, %v552_v3 }
 0x11d   :  { %v1080_v7 = vadd.f32 %v1079_v6, %v560_v5 }
 0x11f   :  { %1096 = vst [vmem:[#allocation5 + $0x38] sm:$0xff] %v1080_v7 }
 0x120   :  { %1152 = shalt.err (!%p1149_p12)
}
 0x121   :  { %s1153_s24 = scalar_lea.hbm %s1212_s1, 1024 }
 0x122   :  { %p1154_p13 = scmp.ne.s32.totalorder %s1212_s1, %s1153_s24  ;;  %p1157_p0 = scmp.lt.u32.totalorder %s1153_s24, %s1212_s1 }
 0x124   :  { %p1159_p1 = pnand %p1157_p0, %p1154_p13 }
 0x126   :  { %1162 = shalt.err (!%p1159_p1)
}
 0x127   :  { %1108 = dma.vmem_to_hbm [thread:$0]  %s1103_s20, 1024, %s1212_s1, [#allocation4], %s1168_s16, %s1168_s16, %s1169_s17  }
 0x128   :  { %1165 = dma.done.wait [#allocation4], 1024  }
 0x129   :  { %1166 = vsyncadd [#allocation4], 4294966272 }
 0x12a   :  { %1112 = vsyncpa [#allocation3], 1 }
 0x12b   :  { %1113 = vsyncpa [#allocation4], 1 }

</bundles_post_ra>
